<compile_context>
chip_gen: v7x
topology: tpu7x:2x2x1
jax: 0.10.0
libtpu: 0.0.40
codegen_flags: <defaults>
</compile_context>

<pallas_src>
import functools

import numpy as np
import jax
import jax.numpy as jnp
from jax.experimental import pallas as pl
from jax.experimental.pallas import tpu as pltpu

_VMEM = pltpu.MemorySpace.VMEM
_SMEM = pltpu.MemorySpace.SMEM


# --------------------------------------------------------------------------------------
# In-kernel helpers
# --------------------------------------------------------------------------------------
def _layer_norm(h, gamma, beta):
    mu = jnp.mean(h, axis=-1, keepdims=True)
    var = jnp.mean(jnp.square(h - mu), axis=-1, keepdims=True)
    return (h - mu) * jax.lax.rsqrt(var + 1e-5) * gamma + beta


def _gelu_exact(h):
    # nn.GELU() default = exact (erf-based) GELU
    return 0.5 * h * (1.0 + jax.lax.erf(h * np.float32(1.0 / np.sqrt(2.0))))


# --------------------------------------------------------------------------------------
# Fused reverse-diffusion chain kernel: grid=(T-1,), state carried in VMEM scratch.
# --------------------------------------------------------------------------------------
def _reverse_chain_kernel(scal_ref,                    # SMEM (T-1, 5) per-step scheduler scalars
                          xinit_ref,                   # VMEM (B, D_IN) initial state x_T
                          w1_ref, vec_ref, w2_ref, w3_ref, b3_ref,   # per-step decoder weights
                          epsg_ref, gum_ref,           # per-step noise (gauss eps, gumbel)
                          mu_ref, pi_ref, xfin_ref,    # outputs
                          state,                       # VMEM scratch (B, D_IN) carried over grid
                          *, n_gauss, group_sizes, hat_offsets, hat_sizes, eps, min_prob):
    s = pl.program_id(0)

    @pl.when(s == 0)
    def _init():
        state[...] = xinit_ref[...]

    z = state[...]                                     # (B, D_IN) current x_t

    # ---- Decoder MLP: Linear -> LayerNorm -> GELU, x2, -> Linear (body1/body2/body5) ----
    vec = vec_ref[...]                                 # (6, H): b1,g1,be1,b2,g2,be2
    h = jnp.dot(z, w1_ref[...], preferred_element_type=jnp.float32) + vec[0:1]
    h = _gelu_exact(_layer_norm(h, vec[1:2], vec[2:3]))
    h = jnp.dot(h, w2_ref[...], preferred_element_type=jnp.float32) + vec[3:4]
    h = _gelu_exact(_layer_norm(h, vec[4:5], vec[5:6]))
    xhat = jnp.dot(h, w3_ref[...], preferred_element_type=jnp.float32) + b3_ref[...]   # (B, D_OUT)

    # ---- per-step scheduler scalars ----
    inv_sqrt_alpha = scal_ref[s, 0]      # 1 / sqrt(alpha_t)
    coef = scal_ref[s, 1]                # beta_t / sqrt(1 - alpha_bar_t)
    sigma_t = scal_ref[s, 2]
    alpha_t = scal_ref[s, 3]
    abar_tm1 = scal_ref[s, 4]

    # ---- Gaussian reverse step (clamp / mu_theta / reparameterized sample) ----
    xg = z[:, 0:n_gauss]
    noise = jnp.clip(xhat[:, 0:n_gauss], -5.0, 5.0)
    mu = inv_sqrt_alpha * (xg - coef * noise)
    mu_ref[...] = mu
    state[:, 0:n_gauss] = mu + sigma_t * epsg_ref[...]

    # ---- categorical reverse step (posterior probs + Gumbel-max sampling) ----
    off = 0
    for gi, k_cat in enumerate(group_sizes):
        hk = hat_sizes[gi]
        x_cat = z[:, n_gauss + off:n_gauss + off + k_cat]
        x0hat = xhat[:, hat_offsets[gi]:hat_offsets[gi] + hk]
        pi = (alpha_t * x_cat + (1.0 - alpha_t) / k_cat) * \
             (abar_tm1 * x0hat + (1.0 - abar_tm1) / hk)
        pi = pi / (jnp.sum(pi, axis=-1, keepdims=True) + eps)
        pi = jnp.maximum(pi, min_prob)
        pi_ref[:, off:off + k_cat] = pi
        g = jnp.log(pi) + gum_ref[:, off:off + k_cat]          # Gumbel-max == categorical sample
        m = jnp.max(g, axis=-1, keepdims=True)
        state[:, n_gauss + off:n_gauss + off + k_cat] = (g >= m).astype(jnp.float32)
        off += k_cat

    xfin_ref[...] = state[...]


# --------------------------------------------------------------------------------------
# Fused Gaussian loss kernel: terminal KL + chain KLs + NLL -> one (1,1) SMEM scalar.
# All scheduler-derived constants are baked in via closure (Python floats at trace time).
# --------------------------------------------------------------------------------------
def _gauss_loss_kernel(x0_ref, xq1_ref, muq_ref, mup_ref, out_ref, *,
                       inv_batch, sqrt_abar_T, var_q_T, log_inv_sq_T,
                       inv_s_p1, log_s_p1, chain_consts):
    x0 = x0_ref[...]                                             # (B, NG)

    # terminal KL( N(sqrt(abar_T) x0, sqrt(1-abar_T)) || N(0,1) ): sum feats, mean batch
    mu_q = sqrt_abar_T * x0
    acc = (log_inv_sq_T + (var_q_T + mu_q * mu_q) * 0.5 - 0.5) * inv_batch

    # Gaussian NLL of q(x1|x0) sample under p(x0|x1) = N(mu_theta_1, sigma_1)
    n_steps = len(chain_consts)
    d = (xq1_ref[...] - mup_ref[n_steps - 1]) * inv_s_p1
    c_nll = log_s_p1 + 0.5 * float(np.log(2.0 * np.pi))
    acc = acc + (0.5 * d * d + c_nll) * inv_batch

    # chain KLs  KL(q(x_{t-1}|x_t,x_0) || p_theta(x_{t-1}|x_t)) summed over steps/batch/feats
    for si in range(n_steps):
        log_ratio, var_q, inv_two_var_p = chain_consts[si]
        dd = muq_ref[si] - mup_ref[si]
        acc = acc + (log_ratio + (var_q + dd * dd) * inv_two_var_p - 0.5)

    out_ref[0, 0] = jnp.sum(acc)


# --------------------------------------------------------------------------------------
# Scheduler / parameter setup (plain numpy / JAX glue)
# --------------------------------------------------------------------------------------
def cosine_scheduler(T, s=0.008, scale_factor=0.1):
    timesteps = np.linspace(0, T, T + 1, dtype=np.float64)
    f_t = np.cos((timesteps / T + s) / (1 + s) * np.pi / 2) ** 2
    f_t /= f_t[0]
    alpha_t = np.clip(f_t * (1 - scale_factor) + scale_factor, 0, 1)
    alpha_bar = np.cumprod(alpha_t)
    beta_t = 1 - alpha_t
    return alpha_bar.astype(np.float32), alpha_t.astype(np.float32), beta_t.astype(np.float32)


def xavier_uniform(key, fan_in, fan_out):
    bound = float(np.sqrt(6.0 / (fan_in + fan_out)))
    return jax.random.uniform(key, (fan_in, fan_out), jnp.float32, -bound, bound)


def init_stacked_decoder_params(key, timesteps, d_in, hidden, d_out):
    """Stack per-timestep decoder weights in reverse-chain step order (s=0 <-> t=T-1)."""
    keys = jax.random.split(key, timesteps)
    w1s, vecs, w2s, w3s, b3s = [], [], [], [], []
    ln_vec = jnp.stack([jnp.zeros((hidden,), jnp.float32),   # b1
                        jnp.ones((hidden,), jnp.float32),    # gamma1
                        jnp.zeros((hidden,), jnp.float32),   # beta1
                        jnp.zeros((hidden,), jnp.float32),   # b2
                        jnp.ones((hidden,), jnp.float32),    # gamma2
                        jnp.zeros((hidden,), jnp.float32)])  # beta2
    for s in range(timesteps - 1):
        t = timesteps - 1 - s
        k1, k2, k3 = jax.random.split(keys[t], 3)
        w1s.append(xavier_uniform(k1, d_in, hidden))
        w2s.append(xavier_uniform(k2, hidden, hidden))
        w3s.append(xavier_uniform(k3, hidden, d_out))
        vecs.append(ln_vec)
        b3s.append(jnp.zeros((1, d_out), jnp.float32))
    return {'w1': jnp.stack(w1s), 'vec': jnp.stack(vecs), 'w2': jnp.stack(w2s),
            'w3': jnp.stack(w3s), 'b3': jnp.stack(b3s)}


# --------------------------------------------------------------------------------------
# DDGM forward factory: captures static config, returns a single-jit forward function.
# --------------------------------------------------------------------------------------
def make_ddgm_forward(feature_type_dict, timesteps):
    ftd = feature_type_dict
    T = timesteps
    T1 = T - 1
    eps = 1e-8
    min_prob = 1e-6

    alpha_bars, alphas, betas = cosine_scheduler(T)

    rd = ftd['real_data']
    n_gauss = rd[-1] + 1 - rd[0]
    bin_params = ftd['binary_param']
    cat_oh = ftd['categorical_one_hot']
    cat_params = ftd['categorical_param']
    n_bin = len(ftd['binary_data'])

    categories_num = [v[1] - v[0] + 1 if v[1] - v[0] == 1 else v[1] - v[0]
                      for v in bin_params + cat_params]
    group_sizes = [2 * n_bin] + [v[1] - v[0] for v in cat_oh]
    # decoder output slices used as \hat{x}_0 per group (bin slice then categorical slices)
    hat_ranges = [(bin_params[0][0], bin_params[0][1] + 1)] + \
                 [(v[0] + 1, v[1] + 1) for v in cat_oh]
    hat_offsets = tuple(r[0] for r in hat_ranges)
    hat_sizes = tuple(r[1] - r[0] for r in hat_ranges)
    ctot = sum(group_sizes)

    # ---------- per-step (trace-time) scheduler constants, step order s=0 <-> t=T-1 ----------
    rev_scal = np.zeros((T1, 5), np.float32)
    chain_consts = []
    c_x0 = np.zeros((T1, 1, 1), np.float32)
    c_xt = np.zeros((T1, 1, 1), np.float32)
    sqrt_abar = np.zeros((T1, 1, 1), np.float32)
    sqrt_1m_abar = np.zeros((T1, 1, 1), np.float32)
    alpha_vec = np.zeros((T1, 1, 1), np.float32)
    abar_vec = np.zeros((T1, 1, 1), np.float32)
    abar_tm1_vec = np.zeros((T1, 1, 1), np.float32)
    for s in range(T1):
        t = T - 1 - s
        abar_tm1 = float(alpha_bars[t - 1]); abar_t = float(alpha_bars[t])
        a_t = float(alphas[t]); b_t = float(betas[t])
        sigma_t = max(float(np.sqrt(b_t * (1.0 - abar_tm1) / (1.0 - abar_t))), eps)
        rev_scal[s] = [1.0 / np.sqrt(a_t), b_t / np.sqrt(1.0 - abar_t), sigma_t, a_t, abar_tm1]
        # q_true and p share the same sigma_t -> log ratio 0 (kept in general form)
        chain_consts.append((0.0, sigma_t * sigma_t, 1.0 / (2.0 * sigma_t * sigma_t)))
        c_x0[s] = np.sqrt(abar_tm1) * b_t / (1.0 - abar_t)
        c_xt[s] = np.sqrt(a_t) * (1.0 - abar_tm1) / (1.0 - abar_t)
        sqrt_abar[s] = np.sqrt(abar_t)
        sqrt_1m_abar[s] = np.sqrt(1.0 - abar_t)
        alpha_vec[s] = a_t; abar_vec[s] = abar_t; abar_tm1_vec[s] = abar_tm1

    abar_T = float(alpha_bars[T])
    sqrt_abar_T = float(np.sqrt(abar_T))
    var_q_T = 1.0 - abar_T
    log_inv_sq_T = float(-0.5 * np.log(1.0 - abar_T))
    sigma_p1 = float(rev_scal[T1 - 1, 2])
    inv_s_p1 = 1.0 / sigma_p1
    log_s_p1 = float(np.log(sigma_p1))

    # ---------- pallas_call builders (invoked at trace time) ----------
    def run_reverse_chain(scal, x_init, params, eps_g, gumbel):
        b = x_init.shape[0]
        d_in = x_init.shape[1]
        hidden = params['w1'].shape[2]
        d_out = params['w3'].shape[2]
        kernel = functools.partial(
            _reverse_chain_kernel,
            n_gauss=n_gauss, group_sizes=tuple(group_sizes),
            hat_offsets=hat_offsets, hat_sizes=hat_sizes,
            eps=eps, min_prob=min_prob)
        return pl.pallas_call(
            kernel,
            grid=(T1,),
            in_specs=[
                pl.BlockSpec(memory_space=_SMEM),                         # scalar table (T1,5)
                pl.BlockSpec((b, d_in), lambda s: (0, 0)),                # x_T (resident)
                pl.BlockSpec((None, d_in, hidden), lambda s: (s, 0, 0)),  # W1 stack
                pl.BlockSpec((None, 6, hidden), lambda s: (s, 0, 0)),     # b1,g1,be1,b2,g2,be2
                pl.BlockSpec((None, hidden, hidden), lambda s: (s, 0, 0)),
                pl.BlockSpec((None, hidden, d_out), lambda s: (s, 0, 0)),
                pl.BlockSpec((None, 1, d_out), lambda s: (s, 0, 0)),      # b3 stack
                pl.BlockSpec((None, b, n_gauss), lambda s: (s, 0, 0)),    # gaussian eps
                pl.BlockSpec((None, b, ctot), lambda s: (s, 0, 0)),       # gumbel noise
            ],
            out_specs=(
                pl.BlockSpec((None, b, n_gauss), lambda s: (s, 0, 0)),    # mu_theta per step
                pl.BlockSpec((None, b, ctot), lambda s: (s, 0, 0)),       # categorical probs
                pl.BlockSpec((b, d_in), lambda s: (0, 0)),                # final state
            ),
            out_shape=(
                jax.ShapeDtypeStruct((T1, b, n_gauss), jnp.float32),
                jax.ShapeDtypeStruct((T1, b, ctot), jnp.float32),
                jax.ShapeDtypeStruct((b, d_in), jnp.float32),
            ),
            scratch_shapes=[pltpu.VMEM((b, d_in), jnp.float32)],
            compiler_params=pltpu.CompilerParams(dimension_semantics=("arbitrary",)),
        )(scal, x_init, params['w1'], params['vec'], params['w2'],
          params['w3'], params['b3'], eps_g, gumbel)

    def run_gauss_loss(x0, xq1, mu_q_true, mu_p):
        b = x0.shape[0]
        kernel = functools.partial(
            _gauss_loss_kernel,
            inv_batch=1.0 / b,
            sqrt_abar_T=sqrt_abar_T, var_q_T=var_q_T, log_inv_sq_T=log_inv_sq_T,
            inv_s_p1=inv_s_p1, log_s_p1=log_s_p1,
            chain_consts=tuple(chain_consts))
        out = pl.pallas_call(
            kernel,
            out_shape=jax.ShapeDtypeStruct((1, 1), jnp.float32),
            in_specs=[pl.BlockSpec(memory_space=_VMEM)] * 4,
            out_specs=pl.BlockSpec(memory_space=_SMEM),
        )(x0, xq1, mu_q_true, mu_p)
        return out[0, 0]

    # ---------- the whole forward under one jit ----------
    @jax.jit
    def ddgm_forward(x, decoder_params, key):
        b = x.shape[0]

        x_0_gauss = x[:, jnp.array(rd)]
        x_bern = [x[:, v] for v in ftd['binary_data']]
        x_bern_oh = [jax.nn.one_hot((xb == 1).astype(jnp.int32), 2, dtype=jnp.float32)
                     for xb in x_bern]
        x_bern_oh = jnp.concatenate(x_bern_oh, axis=1)
        x_0s_cat = [x[:, v[0]:v[1]] for v in cat_oh]
        x_0s_cat.insert(0, x_bern_oh)

        # ---------- forward (noising) q-chain: tiny, kept as fused XLA ----------
        qs_gauss = []
        qs_cat = [[] for _ in x_0s_cat]
        x_t_gauss = x_0_gauss
        x_ts_cat = list(x_0s_cat)
        for t in range(1, T + 1):
            beta_t = float(betas[t])
            loc = float(np.sqrt(1.0 - beta_t)) * x_t_gauss
            scale = float(np.sqrt(beta_t))
            key, k = jax.random.split(key)
            x_t_gauss = loc + scale * jax.random.normal(k, loc.shape, jnp.float32)
            qs_gauss.append((loc, scale))
            for i, x_t_cat in enumerate(x_ts_cat):
                probs = (1.0 - beta_t) * x_t_cat + beta_t / x_t_cat.shape[1]
                probs = probs / (probs.sum(axis=1, keepdims=True) + eps)
                key, k = jax.random.split(key)
                feats = jax.random.categorical(k, jnp.log(probs), axis=-1)
                x_ts_cat[i] = jax.nn.one_hot(feats, categories_num[i], dtype=jnp.float32)
                qs_cat[i].append(probs)

        key, k = jax.random.split(key)
        x_T_gauss = qs_gauss[-1][0] + qs_gauss[-1][1] * \
            jax.random.normal(k, x_0_gauss.shape, jnp.float32)
        x_T_oh = []
        for i, q in enumerate(qs_cat):
            key, k = jax.random.split(key)
            feats = jax.random.categorical(k, jnp.log(q[-1]), axis=-1)
            x_T_oh.append(jax.nn.one_hot(feats, categories_num[i], dtype=jnp.float32))

        # ---------- reverse (denoising) p-chain: ONE fused Pallas launch ----------
        # TODO(synk): the reference builds a time embedding with a freshly-initialised nn.Linear
        # inside Decoder.forward and discards it (body1 runs on `z`), and body3/body4 are unused;
        # that dead code is omitted here.
        x_init = jnp.concatenate([x_T_gauss] + x_T_oh, axis=1)
        key, kg, ku = jax.random.split(key, 3)
        eps_g = jax.random.normal(kg, (T1, b, n_gauss), jnp.float32)
        gumbel = jax.random.gumbel(ku, (T1, b, ctot), jnp.float32)
        mu_p, pi_all, x_fin = run_reverse_chain(jnp.asarray(rev_scal), x_init,
                                                decoder_params, eps_g, gumbel)

        mse = jnp.mean(jnp.square(x_fin[:, 2] - x_0_gauss[:, 2]))  # noqa: F841
        # TODO(synk): reference prints MSE and calls print_histo_step (undefined plt); skipped.

        # ---------- Gaussian loss terms: ONE fused Pallas launch ----------
        key, k = jax.random.split(key)
        q_x1_sample = qs_gauss[0][0] + qs_gauss[0][1] * \
            jax.random.normal(k, x_0_gauss.shape, jnp.float32)
        key, k = jax.random.split(key)
        eps_true = jax.random.normal(k, (T1, b, n_gauss), jnp.float32)
        x_t_true = jnp.asarray(sqrt_abar) * x_0_gauss[None] + jnp.asarray(sqrt_1m_abar) * eps_true
        mu_q_true = jnp.asarray(c_x0) * x_0_gauss[None] + jnp.asarray(c_xt) * x_t_true
        loss_gauss = run_gauss_loss(x_0_gauss, q_x1_sample, mu_q_true, mu_p)

        # ---------- categorical NLL / chain KLs (computed as in reference; not in LOSS_GAUSS)
        nll_cat = 0.0
        off = 0
        for i, k_cat in enumerate(group_sizes):
            key, k = jax.random.split(key)
            samp = jax.random.categorical(k, jnp.log(qs_cat[i][0]), axis=-1)
            p_probs = pi_all[T1 - 1, :, off:off + k_cat]
            p_probs = p_probs / p_probs.sum(axis=1, keepdims=True)
            nll_cat = nll_cat - jnp.log(jnp.take_along_axis(p_probs, samp[:, None], axis=1))[:, 0]
            off += k_cat

        chain_dkls_cat = []  # noqa: F841
        a_v = jnp.asarray(alpha_vec); ab_v = jnp.asarray(abar_vec); abm_v = jnp.asarray(abar_tm1_vec)
        off = 0
        for i, k_cat in enumerate(group_sizes):
            x0c = x_0s_cat[i]
            q_xt_probs = ab_v * x0c[None] + (1.0 - ab_v) / k_cat
            key, k = jax.random.split(key)
            feats = jax.random.categorical(k, jnp.log(q_xt_probs), axis=-1)
            x_t_cat = jax.nn.one_hot(feats, k_cat, dtype=jnp.float32)
            pi_true = (a_v * x_t_cat + (1.0 - a_v) / k_cat) * \
                      (abm_v * x0c[None] + (1.0 - abm_v) / k_cat)
            pi_true = pi_true / (pi_true.sum(-1, keepdims=True) + eps)
            pi_true = jnp.maximum(pi_true, min_prob)
            q_n = pi_true / pi_true.sum(-1, keepdims=True)
            p_t = pi_all[:, :, off:off + k_cat]
            p_n = p_t / p_t.sum(-1, keepdims=True)
            kl = jnp.sum(q_n * (jnp.log(q_n) - jnp.log(p_n)), axis=-1)
            chain_dkls_cat.append(jnp.sum(kl, axis=0))
            off += k_cat

        return loss_gauss   # LOSS_GAUSS = terminal_dkl_gauss + chain_dkl_gauss + nll_gaussian

    return ddgm_forward


# --------------------------------------------------------------------------------------
# Main
# --------------------------------------------------------------------------------------
if __name__ == "__main__":
    key = jax.random.PRNGKey(0)
    B = 8
    input_size = 9       # 4 gaussian + 1 binary + 4-class one-hot columns in raw x
    output_dim = 9
    hidden = 32          # small synthetic decoder arch
    timesteps = 10

    feature_type_dict = {
        'real_data': [0, 1, 2, 3],
        'binary_data': [4],
        'binary_param': [[4, 5]],
        'categorical_one_hot': [[5, 9]],
        'categorical_param': [[5, 9]],
    }

    key, kg, kb, kc = jax.random.split(key, 4)
    x_gauss = jax.random.normal(kg, (B, 4), jnp.float32)
    x_bin = jax.random.bernoulli(kb, 0.5, (B, 1)).astype(jnp.float32)
    cat_idx = jax.random.randint(kc, (B,), 0, 4)
    x_cat = jax.nn.one_hot(cat_idx, 4, dtype=jnp.float32)
    x = jnp.concatenate([x_gauss, x_bin, x_cat], axis=1)     # (B, 9)

    d_in = input_size + 1    # decoder sees gauss(4) + bin one-hot(2) + cat one-hot(4) = 10
    d_out = output_dim + 1   # decoder emits 10 columns (gauss 0:4, bin 4:6, cat 6:10)
    decoder_params = init_stacked_decoder_params(jax.random.PRNGKey(42), timesteps,
                                                 d_in, hidden, d_out)

    ddgm_forward = make_ddgm_forward(feature_type_dict, timesteps)
    key, fkey = jax.random.split(key)
    loss = ddgm_forward(x, decoder_params, fkey)
    jax.block_until_ready(loss)
    print("KERNEL_OK")
</pallas_src>

<mosaic_0001>
module attributes {stable_mosaic.version = 11 : i64} {
  func.func @_gauss_loss_kernel(%arg0: memref<8x4xf32, #tpu.memory_space<vmem>>, %arg1: memref<8x4xf32, #tpu.memory_space<vmem>>, %arg2: memref<9x8x4xf32, #tpu.memory_space<vmem>>, %arg3: memref<9x8x4xf32, #tpu.memory_space<vmem>>, %arg4: memref<1x1xf32, #tpu.memory_space<smem>>) attributes {dimension_semantics = [], scalar_prefetch = 0 : i64, scratch_operands = 0 : i64, tpu.core_type = #tpu.core_type<tc>} {
    %c0 = arith.constant 0 : index
    %c0_0 = arith.constant 0 : index
    %0 = vector.load %arg0[%c0, %c0_0] : memref<8x4xf32, #tpu.memory_space<vmem>>, vector<8x4xf32>
    %cst = arith.constant 0.00829408411 : f32
    %1 = vector.broadcast %cst : f32 to vector<8x4xf32>
    %2 = arith.mulf %1, %0 : vector<8x4xf32>
    %3 = arith.mulf %2, %2 : vector<8x4xf32>
    %cst_1 = arith.constant 0.999931216 : f32
    %4 = vector.broadcast %cst_1 : f32 to vector<8x4xf32>
    %5 = arith.addf %4, %3 : vector<8x4xf32>
    %cst_2 = arith.constant 5.000000e-01 : f32
    %6 = vector.broadcast %cst_2 : f32 to vector<8x4xf32>
    %7 = arith.mulf %5, %6 : vector<8x4xf32>
    %cst_3 = arith.constant 3.439710e-05 : f32
    %8 = vector.broadcast %cst_3 : f32 to vector<8x4xf32>
    %9 = arith.addf %8, %7 : vector<8x4xf32>
    %cst_4 = arith.constant 5.000000e-01 : f32
    %10 = vector.broadcast %cst_4 : f32 to vector<8x4xf32>
    %11 = arith.subf %9, %10 : vector<8x4xf32>
    %cst_5 = arith.constant 1.250000e-01 : f32
    %12 = vector.broadcast %cst_5 : f32 to vector<8x4xf32>
    %13 = arith.mulf %11, %12 : vector<8x4xf32>
    %c0_6 = arith.constant 0 : index
    %c0_7 = arith.constant 0 : index
    %14 = vector.load %arg1[%c0_6, %c0_7] : memref<8x4xf32, #tpu.memory_space<vmem>>, vector<8x4xf32>
    %c8 = arith.constant 8 : index
    %c0_8 = arith.constant 0 : index
    %c0_9 = arith.constant 0 : index
    %15 = vector.load %arg3[%c8, %c0_8, %c0_9] : memref<9x8x4xf32, #tpu.memory_space<vmem>>, vector<1x8x4xf32>
    %16 = vector.shape_cast %15 : vector<1x8x4xf32> to vector<8x4xf32>
    %17 = arith.subf %14, %16 : vector<8x4xf32>
    %cst_10 = arith.constant 1.000000e+08 : f32
    %18 = vector.broadcast %cst_10 : f32 to vector<8x4xf32>
    %19 = arith.mulf %17, %18 : vector<8x4xf32>
    %cst_11 = arith.constant 5.000000e-01 : f32
    %20 = vector.broadcast %cst_11 : f32 to vector<8x4xf32>
    %21 = arith.mulf %20, %19 : vector<8x4xf32>
    %22 = arith.mulf %21, %19 : vector<8x4xf32>
    %cst_12 = arith.constant -17.5017414 : f32
    %23 = vector.broadcast %cst_12 : f32 to vector<8x4xf32>
    %24 = arith.addf %22, %23 : vector<8x4xf32>
    %cst_13 = arith.constant 1.250000e-01 : f32
    %25 = vector.broadcast %cst_13 : f32 to vector<8x4xf32>
    %26 = arith.mulf %24, %25 : vector<8x4xf32>
    %27 = arith.addf %13, %26 : vector<8x4xf32>
    %c0_14 = arith.constant 0 : index
    %c0_15 = arith.constant 0 : index
    %c0_16 = arith.constant 0 : index
    %28 = vector.load %arg2[%c0_14, %c0_15, %c0_16] : memref<9x8x4xf32, #tpu.memory_space<vmem>>, vector<1x8x4xf32>
    %29 = vector.shape_cast %28 : vector<1x8x4xf32> to vector<8x4xf32>
    %c0_17 = arith.constant 0 : index
    %c0_18 = arith.constant 0 : index
    %c0_19 = arith.constant 0 : index
    %30 = vector.load %arg3[%c0_17, %c0_18, %c0_19] : memref<9x8x4xf32, #tpu.memory_space<vmem>>, vector<1x8x4xf32>
    %31 = vector.shape_cast %30 : vector<1x8x4xf32> to vector<8x4xf32>
    %32 = arith.subf %29, %31 : vector<8x4xf32>
    %33 = arith.mulf %32, %32 : vector<8x4xf32>
    %cst_20 = arith.constant 0.873953223 : f32
    %34 = vector.broadcast %cst_20 : f32 to vector<8x4xf32>
    %35 = arith.addf %34, %33 : vector<8x4xf32>
    %cst_21 = arith.constant 5.721130e-01 : f32
    %36 = vector.broadcast %cst_21 : f32 to vector<8x4xf32>
    %37 = arith.mulf %35, %36 : vector<8x4xf32>
    %cst_22 = arith.constant 0.000000e+00 : f32
    %38 = vector.broadcast %cst_22 : f32 to vector<8x4xf32>
    %39 = arith.addf %38, %37 : vector<8x4xf32>
    %cst_23 = arith.constant 5.000000e-01 : f32
    %40 = vector.broadcast %cst_23 : f32 to vector<8x4xf32>
    %41 = arith.subf %39, %40 : vector<8x4xf32>
    %42 = arith.addf %27, %41 : vector<8x4xf32>
    %c1 = arith.constant 1 : index
    %c0_24 = arith.constant 0 : index
    %c0_25 = arith.constant 0 : index
    %43 = vector.load %arg2[%c1, %c0_24, %c0_25] : memref<9x8x4xf32, #tpu.memory_space<vmem>>, vector<1x8x4xf32>
    %44 = vector.shape_cast %43 : vector<1x8x4xf32> to vector<8x4xf32>
    %c1_26 = arith.constant 1 : index
    %c0_27 = arith.constant 0 : index
    %c0_28 = arith.constant 0 : index
    %45 = vector.load %arg3[%c1_26, %c0_27, %c0_28] : memref<9x8x4xf32, #tpu.memory_space<vmem>>, vector<1x8x4xf32>
    %46 = vector.shape_cast %45 : vector<1x8x4xf32> to vector<8x4xf32>
    %47 = arith.subf %44, %46 : vector<8x4xf32>
    %48 = arith.mulf %47, %47 : vector<8x4xf32>
    %cst_29 = arith.constant 0.7948879 : f32
    %49 = vector.broadcast %cst_29 : f32 to vector<8x4xf32>
    %50 = arith.addf %49, %48 : vector<8x4xf32>
    %cst_30 = arith.constant 0.629019499 : f32
    %51 = vector.broadcast %cst_30 : f32 to vector<8x4xf32>
    %52 = arith.mulf %50, %51 : vector<8x4xf32>
    %cst_31 = arith.constant 0.000000e+00 : f32
    %53 = vector.broadcast %cst_31 : f32 to vector<8x4xf32>
    %54 = arith.addf %53, %52 : vector<8x4xf32>
    %cst_32 = arith.constant 5.000000e-01 : f32
    %55 = vector.broadcast %cst_32 : f32 to vector<8x4xf32>
    %56 = arith.subf %54, %55 : vector<8x4xf32>
    %57 = arith.addf %42, %56 : vector<8x4xf32>
    %c2 = arith.constant 2 : index
    %c0_33 = arith.constant 0 : index
    %c0_34 = arith.constant 0 : index
    %58 = vector.load %arg2[%c2, %c0_33, %c0_34] : memref<9x8x4xf32, #tpu.memory_space<vmem>>, vector<1x8x4xf32>
    %59 = vector.shape_cast %58 : vector<1x8x4xf32> to vector<8x4xf32>
    %c2_35 = arith.constant 2 : index
    %c0_36 = arith.constant 0 : index
    %c0_37 = arith.constant 0 : index
    %60 = vector.load %arg3[%c2_35, %c0_36, %c0_37] : memref<9x8x4xf32, #tpu.memory_space<vmem>>, vector<1x8x4xf32>
    %61 = vector.shape_cast %60 : vector<1x8x4xf32> to vector<8x4xf32>
    %62 = arith.subf %59, %61 : vector<8x4xf32>
    %63 = arith.mulf %62, %62 : vector<8x4xf32>
    %cst_38 = arith.constant 0.659744501 : f32
    %64 = vector.broadcast %cst_38 : f32 to vector<8x4xf32>
    %65 = arith.addf %64, %63 : vector<8x4xf32>
    %cst_39 = arith.constant 0.757869124 : f32
    %66 = vector.broadcast %cst_39 : f32 to vector<8x4xf32>
    %67 = arith.mulf %65, %66 : vector<8x4xf32>
    %cst_40 = arith.constant 0.000000e+00 : f32
    %68 = vector.broadcast %cst_40 : f32 to vector<8x4xf32>
    %69 = arith.addf %68, %67 : vector<8x4xf32>
    %cst_41 = arith.constant 5.000000e-01 : f32
    %70 = vector.broadcast %cst_41 : f32 to vector<8x4xf32>
    %71 = arith.subf %69, %70 : vector<8x4xf32>
    %72 = arith.addf %57, %71 : vector<8x4xf32>
    %c3 = arith.constant 3 : index
    %c0_42 = arith.constant 0 : index
    %c0_43 = arith.constant 0 : index
    %73 = vector.load %arg2[%c3, %c0_42, %c0_43] : memref<9x8x4xf32, #tpu.memory_space<vmem>>, vector<1x8x4xf32>
    %74 = vector.shape_cast %73 : vector<1x8x4xf32> to vector<8x4xf32>
    %c3_44 = arith.constant 3 : index
    %c0_45 = arith.constant 0 : index
    %c0_46 = arith.constant 0 : index
    %75 = vector.load %arg3[%c3_44, %c0_45, %c0_46] : memref<9x8x4xf32, #tpu.memory_space<vmem>>, vector<1x8x4xf32>
    %76 = vector.shape_cast %75 : vector<1x8x4xf32> to vector<8x4xf32>
    %77 = arith.subf %74, %76 : vector<8x4xf32>
    %78 = arith.mulf %77, %77 : vector<8x4xf32>
    %cst_47 = arith.constant 0.488207668 : f32
    %79 = vector.broadcast %cst_47 : f32 to vector<8x4xf32>
    %80 = arith.addf %79, %78 : vector<8x4xf32>
    %cst_48 = arith.constant 1.02415431 : f32
    %81 = vector.broadcast %cst_48 : f32 to vector<8x4xf32>
    %82 = arith.mulf %80, %81 : vector<8x4xf32>
    %cst_49 = arith.constant 0.000000e+00 : f32
    %83 = vector.broadcast %cst_49 : f32 to vector<8x4xf32>
    %84 = arith.addf %83, %82 : vector<8x4xf32>
    %cst_50 = arith.constant 5.000000e-01 : f32
    %85 = vector.broadcast %cst_50 : f32 to vector<8x4xf32>
    %86 = arith.subf %84, %85 : vector<8x4xf32>
    %87 = arith.addf %72, %86 : vector<8x4xf32>
    %c4 = arith.constant 4 : index
    %c0_51 = arith.constant 0 : index
    %c0_52 = arith.constant 0 : index
    %88 = vector.load %arg2[%c4, %c0_51, %c0_52] : memref<9x8x4xf32, #tpu.memory_space<vmem>>, vector<1x8x4xf32>
    %89 = vector.shape_cast %88 : vector<1x8x4xf32> to vector<8x4xf32>
    %c4_53 = arith.constant 4 : index
    %c0_54 = arith.constant 0 : index
    %c0_55 = arith.constant 0 : index
    %90 = vector.load %arg3[%c4_53, %c0_54, %c0_55] : memref<9x8x4xf32, #tpu.memory_space<vmem>>, vector<1x8x4xf32>
    %91 = vector.shape_cast %90 : vector<1x8x4xf32> to vector<8x4xf32>
    %92 = arith.subf %89, %91 : vector<8x4xf32>
    %93 = arith.mulf %92, %92 : vector<8x4xf32>
    %cst_56 = arith.constant 0.317284852 : f32
    %94 = vector.broadcast %cst_56 : f32 to vector<8x4xf32>
    %95 = arith.addf %94, %93 : vector<8x4xf32>
    %cst_57 = arith.constant 1.57587099 : f32
    %96 = vector.broadcast %cst_57 : f32 to vector<8x4xf32>
    %97 = arith.mulf %95, %96 : vector<8x4xf32>
    %cst_58 = arith.constant 0.000000e+00 : f32
    %98 = vector.broadcast %cst_58 : f32 to vector<8x4xf32>
    %99 = arith.addf %98, %97 : vector<8x4xf32>
    %cst_59 = arith.constant 5.000000e-01 : f32
    %100 = vector.broadcast %cst_59 : f32 to vector<8x4xf32>
    %101 = arith.subf %99, %100 : vector<8x4xf32>
    %102 = arith.addf %87, %101 : vector<8x4xf32>
    %c5 = arith.constant 5 : index
    %c0_60 = arith.constant 0 : index
    %c0_61 = arith.constant 0 : index
    %103 = vector.load %arg2[%c5, %c0_60, %c0_61] : memref<9x8x4xf32, #tpu.memory_space<vmem>>, vector<1x8x4xf32>
    %104 = vector.shape_cast %103 : vector<1x8x4xf32> to vector<8x4xf32>
    %c5_62 = arith.constant 5 : index
    %c0_63 = arith.constant 0 : index
    %c0_64 = arith.constant 0 : index
    %105 = vector.load %arg3[%c5_62, %c0_63, %c0_64] : memref<9x8x4xf32, #tpu.memory_space<vmem>>, vector<1x8x4xf32>
    %106 = vector.shape_cast %105 : vector<1x8x4xf32> to vector<8x4xf32>
    %107 = arith.subf %104, %106 : vector<8x4xf32>
    %108 = arith.mulf %107, %107 : vector<8x4xf32>
    %cst_65 = arith.constant 0.176238552 : f32
    %109 = vector.broadcast %cst_65 : f32 to vector<8x4xf32>
    %110 = arith.addf %109, %108 : vector<8x4xf32>
    %cst_66 = arith.constant 2.83706379 : f32
    %111 = vector.broadcast %cst_66 : f32 to vector<8x4xf32>
    %112 = arith.mulf %110, %111 : vector<8x4xf32>
    %cst_67 = arith.constant 0.000000e+00 : f32
    %113 = vector.broadcast %cst_67 : f32 to vector<8x4xf32>
    %114 = arith.addf %113, %112 : vector<8x4xf32>
    %cst_68 = arith.constant 5.000000e-01 : f32
    %115 = vector.broadcast %cst_68 : f32 to vector<8x4xf32>
    %116 = arith.subf %114, %115 : vector<8x4xf32>
    %117 = arith.addf %102, %116 : vector<8x4xf32>
    %c6 = arith.constant 6 : index
    %c0_69 = arith.constant 0 : index
    %c0_70 = arith.constant 0 : index
    %118 = vector.load %arg2[%c6, %c0_69, %c0_70] : memref<9x8x4xf32, #tpu.memory_space<vmem>>, vector<1x8x4xf32>
    %119 = vector.shape_cast %118 : vector<1x8x4xf32> to vector<8x4xf32>
    %c6_71 = arith.constant 6 : index
    %c0_72 = arith.constant 0 : index
    %c0_73 = arith.constant 0 : index
    %120 = vector.load %arg3[%c6_71, %c0_72, %c0_73] : memref<9x8x4xf32, #tpu.memory_space<vmem>>, vector<1x8x4xf32>
    %121 = vector.shape_cast %120 : vector<1x8x4xf32> to vector<8x4xf32>
    %122 = arith.subf %119, %121 : vector<8x4xf32>
    %123 = arith.mulf %122, %122 : vector<8x4xf32>
    %cst_74 = arith.constant 0.0770007595 : f32
    %124 = vector.broadcast %cst_74 : f32 to vector<8x4xf32>
    %125 = arith.addf %124, %123 : vector<8x4xf32>
    %cst_75 = arith.constant 6.49344206 : f32
    %126 = vector.broadcast %cst_75 : f32 to vector<8x4xf32>
    %127 = arith.mulf %125, %126 : vector<8x4xf32>
    %cst_76 = arith.constant 0.000000e+00 : f32
    %128 = vector.broadcast %cst_76 : f32 to vector<8x4xf32>
    %129 = arith.addf %128, %127 : vector<8x4xf32>
    %cst_77 = arith.constant 5.000000e-01 : f32
    %130 = vector.broadcast %cst_77 : f32 to vector<8x4xf32>
    %131 = arith.subf %129, %130 : vector<8x4xf32>
    %132 = arith.addf %117, %131 : vector<8x4xf32>
    %c7 = arith.constant 7 : index
    %c0_78 = arith.constant 0 : index
    %c0_79 = arith.constant 0 : index
    %133 = vector.load %arg2[%c7, %c0_78, %c0_79] : memref<9x8x4xf32, #tpu.memory_space<vmem>>, vector<1x8x4xf32>
    %134 = vector.shape_cast %133 : vector<1x8x4xf32> to vector<8x4xf32>
    %c7_80 = arith.constant 7 : index
    %c0_81 = arith.constant 0 : index
    %c0_82 = arith.constant 0 : index
    %135 = vector.load %arg3[%c7_80, %c0_81, %c0_82] : memref<9x8x4xf32, #tpu.memory_space<vmem>>, vector<1x8x4xf32>
    %136 = vector.shape_cast %135 : vector<1x8x4xf32> to vector<8x4xf32>
    %137 = arith.subf %134, %136 : vector<8x4xf32>
    %138 = arith.mulf %137, %137 : vector<8x4xf32>
    %cst_83 = arith.constant 0.0200869758 : f32
    %139 = vector.broadcast %cst_83 : f32 to vector<8x4xf32>
    %140 = arith.addf %139, %138 : vector<8x4xf32>
    %cst_84 = arith.constant 24.8917522 : f32
    %141 = vector.broadcast %cst_84 : f32 to vector<8x4xf32>
    %142 = arith.mulf %140, %141 : vector<8x4xf32>
    %cst_85 = arith.constant 0.000000e+00 : f32
    %143 = vector.broadcast %cst_85 : f32 to vector<8x4xf32>
    %144 = arith.addf %143, %142 : vector<8x4xf32>
    %cst_86 = arith.constant 5.000000e-01 : f32
    %145 = vector.broadcast %cst_86 : f32 to vector<8x4xf32>
    %146 = arith.subf %144, %145 : vector<8x4xf32>
    %147 = arith.addf %132, %146 : vector<8x4xf32>
    %c8_87 = arith.constant 8 : index
    %c0_88 = arith.constant 0 : index
    %c0_89 = arith.constant 0 : index
    %148 = vector.load %arg2[%c8_87, %c0_88, %c0_89] : memref<9x8x4xf32, #tpu.memory_space<vmem>>, vector<1x8x4xf32>
    %149 = vector.shape_cast %148 : vector<1x8x4xf32> to vector<8x4xf32>
    %c8_90 = arith.constant 8 : index
    %c0_91 = arith.constant 0 : index
    %c0_92 = arith.constant 0 : index
    %150 = vector.load %arg3[%c8_90, %c0_91, %c0_92] : memref<9x8x4xf32, #tpu.memory_space<vmem>>, vector<1x8x4xf32>
    %151 = vector.shape_cast %150 : vector<1x8x4xf32> to vector<8x4xf32>
    %152 = arith.subf %149, %151 : vector<8x4xf32>
    %153 = arith.mulf %152, %152 : vector<8x4xf32>
    %cst_93 = arith.constant 1.000000e-16 : f32
    %154 = vector.broadcast %cst_93 : f32 to vector<8x4xf32>
    %155 = arith.addf %154, %153 : vector<8x4xf32>
    %cst_94 = arith.constant 5.000000e+15 : f32
    %156 = vector.broadcast %cst_94 : f32 to vector<8x4xf32>
    %157 = arith.mulf %155, %156 : vector<8x4xf32>
    %cst_95 = arith.constant 0.000000e+00 : f32
    %158 = vector.broadcast %cst_95 : f32 to vector<8x4xf32>
    %159 = arith.addf %158, %157 : vector<8x4xf32>
    %cst_96 = arith.constant 5.000000e-01 : f32
    %160 = vector.broadcast %cst_96 : f32 to vector<8x4xf32>
    %161 = arith.subf %159, %160 : vector<8x4xf32>
    %162 = arith.addf %147, %161 : vector<8x4xf32>
    %163 = vector.shape_cast %162 : vector<8x4xf32> to vector<1x8x4xf32>
    %cst_97 = arith.constant dense<0.000000e+00> : vector<1xf32>
    %164 = vector.multi_reduction <add>, %163, %cst_97 [1, 2] : vector<1x8x4xf32> to vector<1xf32>
    %165 = vector.shape_cast %164 : vector<1xf32> to vector<1x1x1xf32>
    %166 = vector.extract %165[0, 0, 0] : f32 from vector<1x1x1xf32>
    %c0_98 = arith.constant 0 : index
    %c0_99 = arith.constant 0 : index
    %167 = memref.load %arg4[%c0_98, %c0_99] : memref<1x1xf32, #tpu.memory_space<smem>>
    memref.store %166, %arg4[%c0_98, %c0_99] : memref<1x1xf32, #tpu.memory_space<smem>>
    return
  }
}

module attributes {stable_mosaic.version = 11 : i64} {
  func.func @_reverse_chain_kernel(%arg0: i32, %arg1: memref<9x5xf32, #tpu.memory_space<smem>>, %arg2: memref<8x10xf32, #tpu.memory_space<vmem>>, %arg3: memref<1x10x32xf32, #tpu.memory_space<vmem>>, %arg4: memref<1x6x32xf32, #tpu.memory_space<vmem>>, %arg5: memref<1x32x32xf32, #tpu.memory_space<vmem>>, %arg6: memref<1x32x10xf32, #tpu.memory_space<vmem>>, %arg7: memref<1x1x10xf32, #tpu.memory_space<vmem>>, %arg8: memref<1x8x4xf32, #tpu.memory_space<vmem>>, %arg9: memref<1x8x6xf32, #tpu.memory_space<vmem>>, %arg10: memref<1x8x4xf32, #tpu.memory_space<vmem>>, %arg11: memref<1x8x6xf32, #tpu.memory_space<vmem>>, %arg12: memref<8x10xf32, #tpu.memory_space<vmem>>, %arg13: memref<8x10xf32, #tpu.memory_space<vmem>>) attributes {dimension_semantics = [#tpu.dimension_semantics<arbitrary>], iteration_bounds = array<i64: 9>, scalar_prefetch = 0 : i64, scratch_operands = 1 : i64, tpu.core_type = #tpu.core_type<tc>, window_params = [{transform_indices = @transform_0, window_bounds = array<i64: 9, 5>}, {pipeline_mode = #tpu.pipeline_mode<synchronous>, transform_indices = @transform_1, window_bounds = array<i64: 8, 10>}, {transform_indices = @transform_2, window_bounds = array<i64: 1, 10, 32>}, {transform_indices = @transform_3, window_bounds = array<i64: 1, 6, 32>}, {transform_indices = @transform_4, window_bounds = array<i64: 1, 32, 32>}, {transform_indices = @transform_5, window_bounds = array<i64: 1, 32, 10>}, {transform_indices = @transform_6, window_bounds = array<i64: 1, 1, 10>}, {transform_indices = @transform_7, window_bounds = array<i64: 1, 8, 4>}, {transform_indices = @transform_8, window_bounds = array<i64: 1, 8, 6>}, {transform_indices = @transform_9, window_bounds = array<i64: 1, 8, 4>}, {transform_indices = @transform_10, window_bounds = array<i64: 1, 8, 6>}, {pipeline_mode = #tpu.pipeline_mode<synchronous>, transform_indices = @transform_11, window_bounds = array<i64: 8, 10>}]} {
    %c0_i32 = arith.constant 0 : i32
    %0 = arith.cmpi eq, %arg0, %c0_i32 : i32
    %1 = arith.extui %0 : i1 to i32
    %c0_i32_0 = arith.constant 0 : i32
    %2 = arith.cmpi ne, %1, %c0_i32_0 : i32
    scf.if %2 {
      %c0_81 = arith.constant 0 : index
      %c0_82 = arith.constant 0 : index
      %195 = vector.load %arg2[%c0_81, %c0_82] : memref<8x10xf32, #tpu.memory_space<vmem>>, vector<8x10xf32>
      %c0_83 = arith.constant 0 : index
      %c0_84 = arith.constant 0 : index
      %196 = vector.load %arg13[%c0_83, %c0_84] : memref<8x10xf32, #tpu.memory_space<vmem>>, vector<8x10xf32>
      tpu.vector_store %arg13[%c0_83, %c0_84], %195 {strides = array<i32>} : memref<8x10xf32, #tpu.memory_space<vmem>>, vector<8x10xf32>,
    } else {
    }
    %c0 = arith.constant 0 : index
    %c0_1 = arith.constant 0 : index
    %3 = vector.load %arg13[%c0, %c0_1] : memref<8x10xf32, #tpu.memory_space<vmem>>, vector<8x10xf32>
    %c0_2 = arith.constant 0 : index
    %c0_3 = arith.constant 0 : index
    %c0_4 = arith.constant 0 : index
    %4 = vector.load %arg4[%c0_2, %c0_3, %c0_4] : memref<1x6x32xf32, #tpu.memory_space<vmem>>, vector<1x6x32xf32>
    %5 = vector.shape_cast %4 : vector<1x6x32xf32> to vector<6x32xf32>
    %c0_5 = arith.constant 0 : index
    %c0_6 = arith.constant 0 : index
    %c0_7 = arith.constant 0 : index
    %6 = vector.load %arg3[%c0_5, %c0_6, %c0_7] : memref<1x10x32xf32, #tpu.memory_space<vmem>>, vector<1x10x32xf32>
    %7 = vector.shape_cast %6 : vector<1x10x32xf32> to vector<10x32xf32>
    %cst = arith.constant dense<0.000000e+00> : vector<8x32xf32>
    %8 = tpu.matmul %3, %7, %cst {dimension_numbers = #tpu.dot_dimension_numbers<[1], [0], [0], [1], [0, 0, 1, 1], [], []>} : vector<8x10xf32>, vector<10x32xf32>, vector<8x32xf32> -> vector<8x32xf32>
    %9 = vector.extract_strided_slice %5 {offsets = [0, 0], sizes = [1, 32], strides = [1, 1]} : vector<6x32xf32> to vector<1x32xf32>
    %10 = vector.broadcast %9 : vector<1x32xf32> to vector<8x32xf32>
    %11 = arith.addf %8, %10 : vector<8x32xf32>
    %12 = vector.extract_strided_slice %5 {offsets = [1, 0], sizes = [1, 32], strides = [1, 1]} : vector<6x32xf32> to vector<1x32xf32>
    %13 = vector.extract_strided_slice %5 {offsets = [2, 0], sizes = [1, 32], strides = [1, 1]} : vector<6x32xf32> to vector<1x32xf32>
    %cst_8 = arith.constant dense<0.000000e+00> : vector<8xf32>
    %14 = vector.multi_reduction <add>, %11, %cst_8 [1] : vector<8x32xf32> to vector<8xf32>
    %15 = vector.shape_cast %14 : vector<8xf32> to vector<8x1xf32>
    %cst_9 = arith.constant 3.200000e+01 : f32
    %16 = vector.broadcast %cst_9 : f32 to vector<8x1xf32>
    %17 = arith.divf %15, %16 : vector<8x1xf32>
    %18 = vector.broadcast %17 : vector<8x1xf32> to vector<8x32xf32>
    %19 = arith.subf %11, %18 : vector<8x32xf32>
    %20 = arith.mulf %19, %19 : vector<8x32xf32>
    %cst_10 = arith.constant dense<0.000000e+00> : vector<8xf32>
    %21 = vector.multi_reduction <add>, %20, %cst_10 [1] : vector<8x32xf32> to vector<8xf32>
    %22 = vector.shape_cast %21 : vector<8xf32> to vector<8x1xf32>
    %cst_11 = arith.constant 3.200000e+01 : f32
    %23 = vector.broadcast %cst_11 : f32 to vector<8x1xf32>
    %24 = arith.divf %22, %23 : vector<8x1xf32>
    %25 = vector.broadcast %17 : vector<8x1xf32> to vector<8x32xf32>
    %26 = arith.subf %11, %25 : vector<8x32xf32>
    %cst_12 = arith.constant 9.99999974E-6 : f32
    %27 = vector.broadcast %cst_12 : f32 to vector<8x1xf32>
    %28 = arith.addf %24, %27 : vector<8x1xf32>
    %29 = math.rsqrt %28 : vector<8x1xf32>
    %30 = vector.broadcast %29 : vector<8x1xf32> to vector<8x32xf32>
    %31 = arith.mulf %26, %30 : vector<8x32xf32>
    %32 = vector.broadcast %12 : vector<1x32xf32> to vector<8x32xf32>
    %33 = arith.mulf %31, %32 : vector<8x32xf32>
    %34 = vector.broadcast %13 : vector<1x32xf32> to vector<8x32xf32>
    %35 = arith.addf %33, %34 : vector<8x32xf32>
    %cst_13 = arith.constant 5.000000e-01 : f32
    %36 = vector.broadcast %cst_13 : f32 to vector<8x32xf32>
    %37 = arith.mulf %36, %35 : vector<8x32xf32>
    %cst_14 = arith.constant 0.707106769 : f32
    %38 = vector.broadcast %cst_14 : f32 to vector<8x32xf32>
    %39 = arith.mulf %35, %38 : vector<8x32xf32>
    %40 = math.erf %39 : vector<8x32xf32>
    %cst_15 = arith.constant 1.000000e+00 : f32
    %41 = vector.broadcast %cst_15 : f32 to vector<8x32xf32>
    %42 = arith.addf %41, %40 : vector<8x32xf32>
    %43 = arith.mulf %37, %42 : vector<8x32xf32>
    %c0_16 = arith.constant 0 : index
    %c0_17 = arith.constant 0 : index
    %c0_18 = arith.constant 0 : index
    %44 = vector.load %arg5[%c0_16, %c0_17, %c0_18] : memref<1x32x32xf32, #tpu.memory_space<vmem>>, vector<1x32x32xf32>
    %45 = vector.shape_cast %44 : vector<1x32x32xf32> to vector<32x32xf32>
    %cst_19 = arith.constant dense<0.000000e+00> : vector<8x32xf32>
    %46 = tpu.matmul %43, %45, %cst_19 {dimension_numbers = #tpu.dot_dimension_numbers<[1], [0], [0], [1], [0, 0, 1, 1], [], []>} : vector<8x32xf32>, vector<32x32xf32>, vector<8x32xf32> -> vector<8x32xf32>
    %47 = vector.extract_strided_slice %5 {offsets = [3, 0], sizes = [1, 32], strides = [1, 1]} : vector<6x32xf32> to vector<1x32xf32>
    %48 = vector.broadcast %47 : vector<1x32xf32> to vector<8x32xf32>
    %49 = arith.addf %46, %48 : vector<8x32xf32>
    %50 = vector.extract_strided_slice %5 {offsets = [4, 0], sizes = [1, 32], strides = [1, 1]} : vector<6x32xf32> to vector<1x32xf32>
    %51 = vector.extract_strided_slice %5 {offsets = [5, 0], sizes = [1, 32], strides = [1, 1]} : vector<6x32xf32> to vector<1x32xf32>
    %cst_20 = arith.constant dense<0.000000e+00> : vector<8xf32>
    %52 = vector.multi_reduction <add>, %49, %cst_20 [1] : vector<8x32xf32> to vector<8xf32>
    %53 = vector.shape_cast %52 : vector<8xf32> to vector<8x1xf32>
    %cst_21 = arith.constant 3.200000e+01 : f32
    %54 = vector.broadcast %cst_21 : f32 to vector<8x1xf32>
    %55 = arith.divf %53, %54 : vector<8x1xf32>
    %56 = vector.broadcast %55 : vector<8x1xf32> to vector<8x32xf32>
    %57 = arith.subf %49, %56 : vector<8x32xf32>
    %58 = arith.mulf %57, %57 : vector<8x32xf32>
    %cst_22 = arith.constant dense<0.000000e+00> : vector<8xf32>
    %59 = vector.multi_reduction <add>, %58, %cst_22 [1] : vector<8x32xf32> to vector<8xf32>
    %60 = vector.shape_cast %59 : vector<8xf32> to vector<8x1xf32>
    %cst_23 = arith.constant 3.200000e+01 : f32
    %61 = vector.broadcast %cst_23 : f32 to vector<8x1xf32>
    %62 = arith.divf %60, %61 : vector<8x1xf32>
    %63 = vector.broadcast %55 : vector<8x1xf32> to vector<8x32xf32>
    %64 = arith.subf %49, %63 : vector<8x32xf32>
    %cst_24 = arith.constant 9.99999974E-6 : f32
    %65 = vector.broadcast %cst_24 : f32 to vector<8x1xf32>
    %66 = arith.addf %62, %65 : vector<8x1xf32>
    %67 = math.rsqrt %66 : vector<8x1xf32>
    %68 = vector.broadcast %67 : vector<8x1xf32> to vector<8x32xf32>
    %69 = arith.mulf %64, %68 : vector<8x32xf32>
    %70 = vector.broadcast %50 : vector<1x32xf32> to vector<8x32xf32>
    %71 = arith.mulf %69, %70 : vector<8x32xf32>
    %72 = vector.broadcast %51 : vector<1x32xf32> to vector<8x32xf32>
    %73 = arith.addf %71, %72 : vector<8x32xf32>
    %cst_25 = arith.constant 5.000000e-01 : f32
    %74 = vector.broadcast %cst_25 : f32 to vector<8x32xf32>
    %75 = arith.mulf %74, %73 : vector<8x32xf32>
    %cst_26 = arith.constant 0.707106769 : f32
    %76 = vector.broadcast %cst_26 : f32 to vector<8x32xf32>
    %77 = arith.mulf %73, %76 : vector<8x32xf32>
    %78 = math.erf %77 : vector<8x32xf32>
    %cst_27 = arith.constant 1.000000e+00 : f32
    %79 = vector.broadcast %cst_27 : f32 to vector<8x32xf32>
    %80 = arith.addf %79, %78 : vector<8x32xf32>
    %81 = arith.mulf %75, %80 : vector<8x32xf32>
    %c0_28 = arith.constant 0 : index
    %c0_29 = arith.constant 0 : index
    %c0_30 = arith.constant 0 : index
    %82 = vector.load %arg6[%c0_28, %c0_29, %c0_30] : memref<1x32x10xf32, #tpu.memory_space<vmem>>, vector<1x32x10xf32>
    %83 = vector.shape_cast %82 : vector<1x32x10xf32> to vector<32x10xf32>
    %cst_31 = arith.constant dense<0.000000e+00> : vector<8x10xf32>
    %84 = tpu.matmul %81, %83, %cst_31 {dimension_numbers = #tpu.dot_dimension_numbers<[1], [0], [0], [1], [0, 0, 1, 1], [], []>} : vector<8x32xf32>, vector<32x10xf32>, vector<8x10xf32> -> vector<8x10xf32>
    %c0_32 = arith.constant 0 : index
    %c0_33 = arith.constant 0 : index
    %c0_34 = arith.constant 0 : index
    %85 = vector.load %arg7[%c0_32, %c0_33, %c0_34] : memref<1x1x10xf32, #tpu.memory_space<vmem>>, vector<1x1x10xf32>
    %86 = vector.shape_cast %85 : vector<1x1x10xf32> to vector<1x10xf32>
    %87 = vector.broadcast %86 : vector<1x10xf32> to vector<8x10xf32>
    %88 = arith.addf %84, %87 : vector<8x10xf32>
    %89 = arith.index_cast %arg0 : i32 to index
    %c0_35 = arith.constant 0 : index
    %90 = memref.load %arg1[%89, %c0_35] : memref<9x5xf32, #tpu.memory_space<smem>>
    %91 = arith.index_cast %arg0 : i32 to index
    %c1 = arith.constant 1 : index
    %92 = memref.load %arg1[%91, %c1] : memref<9x5xf32, #tpu.memory_space<smem>>
    %93 = arith.index_cast %arg0 : i32 to index
    %c2 = arith.constant 2 : index
    %94 = memref.load %arg1[%93, %c2] : memref<9x5xf32, #tpu.memory_space<smem>>
    %95 = arith.index_cast %arg0 : i32 to index
    %c3 = arith.constant 3 : index
    %96 = memref.load %arg1[%95, %c3] : memref<9x5xf32, #tpu.memory_space<smem>>
    %97 = arith.index_cast %arg0 : i32 to index
    %c4 = arith.constant 4 : index
    %98 = memref.load %arg1[%97, %c4] : memref<9x5xf32, #tpu.memory_space<smem>>
    %99 = vector.extract_strided_slice %3 {offsets = [0, 0], sizes = [8, 4], strides = [1, 1]} : vector<8x10xf32> to vector<8x4xf32>
    %100 = vector.extract_strided_slice %88 {offsets = [0, 0], sizes = [8, 4], strides = [1, 1]} : vector<8x10xf32> to vector<8x4xf32>
    %cst_36 = arith.constant -5.000000e+00 : f32
    %cst_37 = arith.constant 5.000000e+00 : f32
    %101 = vector.broadcast %cst_36 : f32 to vector<8x4xf32>
    %102 = arith.maximumf %101, %100 : vector<8x4xf32>
    %103 = vector.broadcast %cst_37 : f32 to vector<8x4xf32>
    %104 = arith.minimumf %103, %102 : vector<8x4xf32>
    %105 = vector.broadcast %92 : f32 to vector<8x4xf32>
    %106 = arith.mulf %105, %104 : vector<8x4xf32>
    %107 = arith.subf %99, %106 : vector<8x4xf32>
    %108 = vector.broadcast %90 : f32 to vector<8x4xf32>
    %109 = arith.mulf %108, %107 : vector<8x4xf32>
    %c0_38 = arith.constant 0 : index
    %c0_39 = arith.constant 0 : index
    %c0_40 = arith.constant 0 : index
    %110 = vector.load %arg10[%c0_38, %c0_39, %c0_40] : memref<1x8x4xf32, #tpu.memory_space<vmem>>, vector<1x8x4xf32>
    %111 = vector.shape_cast %110 : vector<1x8x4xf32> to vector<8x4xf32>
    %112 = vector.shape_cast %109 : vector<8x4xf32> to vector<1x8x4xf32>
    tpu.vector_store %arg10[%c0_38, %c0_39, %c0_40], %112 {strides = array<i32>} : memref<1x8x4xf32, #tpu.memory_space<vmem>>, vector<1x8x4xf32>,
    %c0_41 = arith.constant 0 : index
    %c0_42 = arith.constant 0 : index
    %c0_43 = arith.constant 0 : index
    %113 = vector.load %arg8[%c0_41, %c0_42, %c0_43] : memref<1x8x4xf32, #tpu.memory_space<vmem>>, vector<1x8x4xf32>
    %114 = vector.shape_cast %113 : vector<1x8x4xf32> to vector<8x4xf32>
    %115 = vector.broadcast %94 : f32 to vector<8x4xf32>
    %116 = arith.mulf %115, %114 : vector<8x4xf32>
    %117 = arith.addf %109, %116 : vector<8x4xf32>
    %c0_44 = arith.constant 0 : index
    %c0_45 = arith.constant 0 : index
    %118 = vector.load %arg13[%c0_44, %c0_45] : memref<8x10xf32, #tpu.memory_space<vmem>>, vector<8x4xf32>
    tpu.vector_store %arg13[%c0_44, %c0_45], %117 {strides = array<i32>} : memref<8x10xf32, #tpu.memory_space<vmem>>, vector<8x4xf32>,
    %119 = vector.extract_strided_slice %3 {offsets = [0, 4], sizes = [8, 2], strides = [1, 1]} : vector<8x10xf32> to vector<8x2xf32>
    %120 = vector.extract_strided_slice %88 {offsets = [0, 4], sizes = [8, 2], strides = [1, 1]} : vector<8x10xf32> to vector<8x2xf32>
    %121 = vector.broadcast %96 : f32 to vector<8x2xf32>
    %122 = arith.mulf %121, %119 : vector<8x2xf32>
    %cst_46 = arith.constant 1.000000e+00 : f32
    %123 = arith.subf %cst_46, %96 : f32
    %cst_47 = arith.constant 2.000000e+00 : f32
    %124 = arith.divf %123, %cst_47 : f32
    %125 = vector.broadcast %124 : f32 to vector<8x2xf32>
    %126 = arith.addf %122, %125 : vector<8x2xf32>
    %127 = vector.broadcast %98 : f32 to vector<8x2xf32>
    %128 = arith.mulf %127, %120 : vector<8x2xf32>
    %cst_48 = arith.constant 1.000000e+00 : f32
    %129 = arith.subf %cst_48, %98 : f32
    %cst_49 = arith.constant 2.000000e+00 : f32
    %130 = arith.divf %129, %cst_49 : f32
    %131 = vector.broadcast %130 : f32 to vector<8x2xf32>
    %132 = arith.addf %128, %131 : vector<8x2xf32>
    %133 = arith.mulf %126, %132 : vector<8x2xf32>
    %cst_50 = arith.constant dense<0.000000e+00> : vector<8xf32>
    %134 = vector.multi_reduction <add>, %133, %cst_50 [1] : vector<8x2xf32> to vector<8xf32>
    %135 = vector.shape_cast %134 : vector<8xf32> to vector<8x1xf32>
    %cst_51 = arith.constant 9.99999993E-9 : f32
    %136 = vector.broadcast %cst_51 : f32 to vector<8x1xf32>
    %137 = arith.addf %135, %136 : vector<8x1xf32>
    %138 = vector.broadcast %137 : vector<8x1xf32> to vector<8x2xf32>
    %139 = arith.divf %133, %138 : vector<8x2xf32>
    %cst_52 = arith.constant 9.99999997E-7 : f32
    %140 = vector.broadcast %cst_52 : f32 to vector<8x2xf32>
    %141 = arith.maximumf %139, %140 : vector<8x2xf32>
    %c0_53 = arith.constant 0 : index
    %c0_54 = arith.constant 0 : index
    %c0_55 = arith.constant 0 : index
    %142 = vector.load %arg11[%c0_53, %c0_54, %c0_55] : memref<1x8x6xf32, #tpu.memory_space<vmem>>, vector<1x8x2xf32>
    %143 = vector.shape_cast %142 : vector<1x8x2xf32> to vector<8x2xf32>
    %144 = vector.shape_cast %141 : vector<8x2xf32> to vector<1x8x2xf32>
    tpu.vector_store %arg11[%c0_53, %c0_54, %c0_55], %144 {strides = array<i32>} : memref<1x8x6xf32, #tpu.memory_space<vmem>>, vector<1x8x2xf32>,
    %145 = math.log %141 : vector<8x2xf32>
    %c0_56 = arith.constant 0 : index
    %c0_57 = arith.constant 0 : index
    %c0_58 = arith.constant 0 : index
    %146 = vector.load %arg9[%c0_56, %c0_57, %c0_58] : memref<1x8x6xf32, #tpu.memory_space<vmem>>, vector<1x8x2xf32>
    %147 = vector.shape_cast %146 : vector<1x8x2xf32> to vector<8x2xf32>
    %148 = arith.addf %145, %147 : vector<8x2xf32>
    %cst_59 = arith.constant dense<0xFF800000> : vector<8xf32>
    %149 = vector.multi_reduction <maximumf>, %148, %cst_59 [1] : vector<8x2xf32> to vector<8xf32>
    %150 = vector.shape_cast %149 : vector<8xf32> to vector<8x1xf32>
    %151 = vector.broadcast %150 : vector<8x1xf32> to vector<8x2xf32>
    %152 = arith.cmpf oge, %148, %151 : vector<8x2xf32>
    %153 = arith.extui %152 : vector<8x2xi1> to vector<8x2xi32>
    %154 = arith.sitofp %153 : vector<8x2xi32> to vector<8x2xf32>
    %c0_60 = arith.constant 0 : index
    %c4_61 = arith.constant 4 : index
    %155 = vector.load %arg13[%c0_60, %c4_61] : memref<8x10xf32, #tpu.memory_space<vmem>>, vector<8x2xf32>
    tpu.vector_store %arg13[%c0_60, %c4_61], %154 {strides = array<i32>} : memref<8x10xf32, #tpu.memory_space<vmem>>, vector<8x2xf32>,
    %156 = vector.extract_strided_slice %3 {offsets = [0, 6], sizes = [8, 4], strides = [1, 1]} : vector<8x10xf32> to vector<8x4xf32>
    %157 = vector.extract_strided_slice %88 {offsets = [0, 6], sizes = [8, 4], strides = [1, 1]} : vector<8x10xf32> to vector<8x4xf32>
    %158 = vector.broadcast %96 : f32 to vector<8x4xf32>
    %159 = arith.mulf %158, %156 : vector<8x4xf32>
    %cst_62 = arith.constant 1.000000e+00 : f32
    %160 = arith.subf %cst_62, %96 : f32
    %cst_63 = arith.constant 4.000000e+00 : f32
    %161 = arith.divf %160, %cst_63 : f32
    %162 = vector.broadcast %161 : f32 to vector<8x4xf32>
    %163 = arith.addf %159, %162 : vector<8x4xf32>
    %164 = vector.broadcast %98 : f32 to vector<8x4xf32>
    %165 = arith.mulf %164, %157 : vector<8x4xf32>
    %cst_64 = arith.constant 1.000000e+00 : f32
    %166 = arith.subf %cst_64, %98 : f32
    %cst_65 = arith.constant 4.000000e+00 : f32
    %167 = arith.divf %166, %cst_65 : f32
    %168 = vector.broadcast %167 : f32 to vector<8x4xf32>
    %169 = arith.addf %165, %168 : vector<8x4xf32>
    %170 = arith.mulf %163, %169 : vector<8x4xf32>
    %cst_66 = arith.constant dense<0.000000e+00> : vector<8xf32>
    %171 = vector.multi_reduction <add>, %170, %cst_66 [1] : vector<8x4xf32> to vector<8xf32>
    %172 = vector.shape_cast %171 : vector<8xf32> to vector<8x1xf32>
    %cst_67 = arith.constant 9.99999993E-9 : f32
    %173 = vector.broadcast %cst_67 : f32 to vector<8x1xf32>
    %174 = arith.addf %172, %173 : vector<8x1xf32>
    %175 = vector.broadcast %174 : vector<8x1xf32> to vector<8x4xf32>
    %176 = arith.divf %170, %175 : vector<8x4xf32>
    %cst_68 = arith.constant 9.99999997E-7 : f32
    %177 = vector.broadcast %cst_68 : f32 to vector<8x4xf32>
    %178 = arith.maximumf %176, %177 : vector<8x4xf32>
    %c0_69 = arith.constant 0 : index
    %c0_70 = arith.constant 0 : index
    %c2_71 = arith.constant 2 : index
    %179 = vector.load %arg11[%c0_69, %c0_70, %c2_71] : memref<1x8x6xf32, #tpu.memory_space<vmem>>, vector<1x8x4xf32>
    %180 = vector.shape_cast %179 : vector<1x8x4xf32> to vector<8x4xf32>
    %181 = vector.shape_cast %178 : vector<8x4xf32> to vector<1x8x4xf32>
    tpu.vector_store %arg11[%c0_69, %c0_70, %c2_71], %181 {strides = array<i32>} : memref<1x8x6xf32, #tpu.memory_space<vmem>>, vector<1x8x4xf32>,
    %182 = math.log %178 : vector<8x4xf32>
    %c0_72 = arith.constant 0 : index
    %c0_73 = arith.constant 0 : index
    %c2_74 = arith.constant 2 : index
    %183 = vector.load %arg9[%c0_72, %c0_73, %c2_74] : memref<1x8x6xf32, #tpu.memory_space<vmem>>, vector<1x8x4xf32>
    %184 = vector.shape_cast %183 : vector<1x8x4xf32> to vector<8x4xf32>
    %185 = arith.addf %182, %184 : vector<8x4xf32>
    %cst_75 = arith.constant dense<0xFF800000> : vector<8xf32>
    %186 = vector.multi_reduction <maximumf>, %185, %cst_75 [1] : vector<8x4xf32> to vector<8xf32>
    %187 = vector.shape_cast %186 : vector<8xf32> to vector<8x1xf32>
    %188 = vector.broadcast %187 : vector<8x1xf32> to vector<8x4xf32>
    %189 = arith.cmpf oge, %185, %188 : vector<8x4xf32>
    %190 = arith.extui %189 : vector<8x4xi1> to vector<8x4xi32>
    %191 = arith.sitofp %190 : vector<8x4xi32> to vector<8x4xf32>
    %c0_76 = arith.constant 0 : index
    %c6 = arith.constant 6 : index
    %192 = vector.load %arg13[%c0_76, %c6] : memref<8x10xf32, #tpu.memory_space<vmem>>, vector<8x4xf32>
    tpu.vector_store %arg13[%c0_76, %c6], %191 {strides = array<i32>} : memref<8x10xf32, #tpu.memory_space<vmem>>, vector<8x4xf32>,
    %c0_77 = arith.constant 0 : index
    %c0_78 = arith.constant 0 : index
    %193 = vector.load %arg13[%c0_77, %c0_78] : memref<8x10xf32, #tpu.memory_space<vmem>>, vector<8x10xf32>
    %c0_79 = arith.constant 0 : index
    %c0_80 = arith.constant 0 : index
    %194 = vector.load %arg12[%c0_79, %c0_80] : memref<8x10xf32, #tpu.memory_space<vmem>>, vector<8x10xf32>
    tpu.vector_store %arg12[%c0_79, %c0_80], %193 {strides = array<i32>} : memref<8x10xf32, #tpu.memory_space<vmem>>, vector<8x10xf32>,
    return
  }
  func.func @transform_0(%arg0: i32) -> (i32, i32) {
    %c0_i32 = arith.constant 0 : i32
    %c0_i32_0 = arith.constant 0 : i32
    %c0_i32_1 = arith.constant 0 : i32
    return %c0_i32, %c0_i32_0 : i32, i32
  }
  func.func @transform_1(%arg0: i32) -> (i32, i32) {
    %c0_i32 = arith.constant 0 : i32
    %c0_i32_0 = arith.constant 0 : i32
    %c0_i32_1 = arith.constant 0 : i32
    return %c0_i32, %c0_i32_0 : i32, i32
  }
  func.func @transform_2(%arg0: i32) -> (i32, i32, i32) {
    %c0_i32 = arith.constant 0 : i32
    %c0_i32_0 = arith.constant 0 : i32
    %c0_i32_1 = arith.constant 0 : i32
    return %arg0, %c0_i32, %c0_i32_0 : i32, i32, i32
  }
  func.func @transform_3(%arg0: i32) -> (i32, i32, i32) {
    %c0_i32 = arith.constant 0 : i32
    %c0_i32_0 = arith.constant 0 : i32
    %c0_i32_1 = arith.constant 0 : i32
    return %arg0, %c0_i32, %c0_i32_0 : i32, i32, i32
  }
  func.func @transform_4(%arg0: i32) -> (i32, i32, i32) {
    %c0_i32 = arith.constant 0 : i32
    %c0_i32_0 = arith.constant 0 : i32
    %c0_i32_1 = arith.constant 0 : i32
    return %arg0, %c0_i32, %c0_i32_0 : i32, i32, i32
  }
  func.func @transform_5(%arg0: i32) -> (i32, i32, i32) {
    %c0_i32 = arith.constant 0 : i32
    %c0_i32_0 = arith.constant 0 : i32
    %c0_i32_1 = arith.constant 0 : i32
    return %arg0, %c0_i32, %c0_i32_0 : i32, i32, i32
  }
  func.func @transform_6(%arg0: i32) -> (i32, i32, i32) {
    %c0_i32 = arith.constant 0 : i32
    %c0_i32_0 = arith.constant 0 : i32
    %c0_i32_1 = arith.constant 0 : i32
    return %arg0, %c0_i32, %c0_i32_0 : i32, i32, i32
  }
  func.func @transform_7(%arg0: i32) -> (i32, i32, i32) {
    %c0_i32 = arith.constant 0 : i32
    %c0_i32_0 = arith.constant 0 : i32
    %c0_i32_1 = arith.constant 0 : i32
    return %arg0, %c0_i32, %c0_i32_0 : i32, i32, i32
  }
  func.func @transform_8(%arg0: i32) -> (i32, i32, i32) {
    %c0_i32 = arith.constant 0 : i32
    %c0_i32_0 = arith.constant 0 : i32
    %c0_i32_1 = arith.constant 0 : i32
    return %arg0, %c0_i32, %c0_i32_0 : i32, i32, i32
  }
  func.func @transform_9(%arg0: i32) -> (i32, i32, i32) {
    %c0_i32 = arith.constant 0 : i32
    %c0_i32_0 = arith.constant 0 : i32
    %c0_i32_1 = arith.constant 0 : i32
    return %arg0, %c0_i32, %c0_i32_0 : i32, i32, i32
  }
  func.func @transform_10(%arg0: i32) -> (i32, i32, i32) {
    %c0_i32 = arith.constant 0 : i32
    %c0_i32_0 = arith.constant 0 : i32
    %c0_i32_1 = arith.constant 0 : i32
    return %arg0, %c0_i32, %c0_i32_0 : i32, i32, i32
  }
  func.func @transform_11(%arg0: i32) -> (i32, i32) {
    %c0_i32 = arith.constant 0 : i32
    %c0_i32_0 = arith.constant 0 : i32
    %c0_i32_1 = arith.constant 0 : i32
    return %c0_i32, %c0_i32_0 : i32, i32
  }
}

</mosaic_0001>

<bundles_post_ra>
// kernel: ddgm_forward.3
= control target key start
LH: loop header
LB: loop body
LE: loop exit
PB: predicated region body
PF: predicated region fallthrough
CT: control target
= control target key end

     0   :  { %s296_s0 = inlined_call_operand.vmem [shape: f32[8,4], index: 0, kind: input, shape index: {}]   ;;  %s297_s1 = inlined_call_operand.vmem [shape: f32[8,4], index: 1, kind: input, shape index: {}]   ;;  %s298_s2 = inlined_call_operand.vmem [shape: f32[9,8,4], index: 2, kind: input, shape index: {}]   ;;  %s299_s3 = inlined_call_operand.vmem [shape: f32[9,8,4], index: 3, kind: input, shape index: {}]   ;;  %s300_s4 = inlined_call_operand.hbm [shape: f32[1,1], index: 4, kind: output, shape index: {}]  }
   0x1   :  { %v18_v0 = vld [vmem:[%s296_s0] sm:$0xff]  ;;  %v160_v7 = vld [vmem:[%s298_s2 + $0x8] sm:$0xff]  ;;  %v163_v10 = vld [vmem:[%s298_s2 + $0x10] sm:$0xff] }
   0x2   :  { %v26_v1 = vld [vmem:[%s297_s1] sm:$0xff]  ;;  %v19_v3 = vmul.f32 0.008294084, %v18_v0  ;;  %v161_v9 = vld [vmem:[%s299_s3 + $0x8] sm:$0xff]  ;;  %v164_v11 = vld [vmem:[%s299_s3 + $0x10] sm:$0xff] }
   0x3   :  { %v158_v2 = vld [vmem:[%s299_s3 + $0x40] sm:$0xff]  ;;  %v49_v14 = vsub.f32 %v160_v7, %v161_v9  ;;  %v60_v15 = vsub.f32 %v163_v10, %v164_v11  ;;  %v166_v16 = vld [vmem:[%s298_s2 + $0x18] sm:$0xff]  ;;  %v172_v22 = vld [vmem:[%s298_s2 + $0x28] sm:$0xff] }
   0x4   :  { %v29_v4 = vsub.f32 %v26_v1, %v158_v2  ;;  %v36_v5 = vld [vmem:[%s298_s2] sm:$0xff]  ;;  %v20_v12 = vmul.f32 %v19_v3, %v19_v3  ;;  %v167_v17 = vld [vmem:[%s299_s3 + $0x18] sm:$0xff]  ;;  %v173_v23 = vld [vmem:[%s299_s3 + $0x28] sm:$0xff] }
   0x5   :  { %v37_v6 = vld [vmem:[%s299_s3] sm:$0xff]  ;;  %v71_v20 = vsub.f32 %v166_v16, %v167_v17  ;;  %v50_v26 = vmul.f32 %v49_v14, %v49_v14  ;;  %v61_v27 = vmul.f32 %v60_v15, %v60_v15  ;;  %v93_v31 = vsub.f32 %v172_v22, %v173_v23  ;;  %v175_v32 = vld [vmem:[%s298_s2 + $0x30] sm:$0xff] }
   0x6   :  { %v38_v8 = vsub.f32 %v36_v5, %v37_v6  ;;  %v30_v13 = vmul.f32 1e+08, %v29_v4  ;;  %v169_v18 = vld [vmem:[%s298_s2 + $0x20] sm:$0xff]  ;;  %v21_v24 = vadd.f32 0.9999312, %v20_v12  ;;  %v176_v33 = vld [vmem:[%s299_s3 + $0x30] sm:$0xff] }
   0x7   :  { %v170_v21 = vld [vmem:[%s299_s3 + $0x20] sm:$0xff]  ;;  %v72_v29 = vmul.f32 %v71_v20, %v71_v20 }
   0x8   :  { %v39_v19 = vmul.f32 %v38_v8, %v38_v8  ;;  %v31_v25 = vmul.f32 0.5, %v30_v13  ;;  %v82_v30 = vsub.f32 %v169_v18, %v170_v21 }
   0xa   :  { %v40_v28 = vadd.f32 0.8739532, %v39_v19 }
   0xb   :  { %9 = vsyncpa [#allocation3], 0  ;;  %v22_v34 = vmul.f32 0.5, %v21_v24  ;;  %v32_v35 = vmul.f32 %v31_v25, %v30_v13  ;;  %v51_v36 = vadd.f32 0.7948879, %v50_v26  ;;  %v178_v39 = vld [vmem:[%s298_s2 + $0x38] sm:$0xff]  ;;  %v83_v43 = vmul.f32 %v82_v30, %v82_v30 }
   0xc   :  { %v41_v37 = vmul.f32 0.572113, %v40_v28  ;;  %v62_v38 = vadd.f32 0.6597445, %v61_v27  ;;  %v179_v40 = vld [vmem:[%s299_s3 + $0x38] sm:$0xff]  ;;  %v104_v44 = vsub.f32 %v175_v32, %v176_v33  ;;  %v94_v46 = vmul.f32 %v93_v31, %v93_v31  ;;  %v181_v47 = vld [vmem:[%s298_s2 + $0x40] sm:$0xff] }
   0xd   :  { %v23_v41 = vadd.f32 3.43971e-05, %v22_v34  ;;  %v33_v42 = vadd.f32 -17.501741, %v32_v35  ;;  %v73_v45 = vadd.f32 0.48820767, %v72_v29  ;;  %v115_v51 = vsub.f32 %v178_v39, %v179_v40 }
   0xe   :  { %v52_v50 = vmul.f32 0.6290195, %v51_v36  ;;  %v159_v52 = vadd.f32 -0.5, %v41_v37  ;;  %v63_v53 = vmul.f32 0.7578691, %v62_v38  ;;  %v105_v56 = vmul.f32 %v104_v44, %v104_v44  ;;  %s186_s26 = scalar_lea.hbm %s300_s4, 16 }
   0xf   :  { %v157_v48 = vadd.f32 -0.5, %v23_v41  ;;  %v34_v49 = vmul.f32 0.125, %v33_v42  ;;  %v84_v55 = vadd.f32 0.31728485, %v83_v43  ;;  %v124_v57 = vsub.f32 %v181_v47, %v158_v2  ;;  %p187_p0 = scmp.ne.s32.totalorder %s300_s4, %s186_s26  ;;  %p190_p1 = scmp.lt.u32.totalorder %s186_s26, %s300_s4 }
  0x10   :  { %v74_v58 = vmul.f32 1.0241543, %v73_v45  ;;  %v162_v60 = vadd.f32 -0.5, %v52_v50  ;;  %v95_v61 = vadd.f32 0.17623855, %v94_v46  ;;  %v116_v62 = vmul.f32 %v115_v51, %v115_v51 }
  0x11   :  { %v25_v54 = vmul.f32 0.125, %v157_v48  ;;  %v165_v63 = vadd.f32 -0.5, %v63_v53  ;;  %v85_v1 = vmul.f32 1.575871, %v84_v55  ;;  %v106_v3 = vadd.f32 0.07700076, %v105_v56  ;;  %p192_p2 = pnand %p190_p1, %p187_p0 }
  0x12   :  { %v125_v4 = vmul.f32 %v124_v57, %v124_v57  ;;  %v168_v6 = vadd.f32 -0.5, %v74_v58  ;;  %v96_v7 = vmul.f32 2.8370638, %v95_v61  ;;  %v117_v8 = vadd.f32 0.020086976, %v116_v62 }
  0x13   :  { %v35_v59 = vadd.f32 %v34_v49, %v25_v54  ;;  %v171_v10 = vadd.f32 -0.5, %v85_v1  ;;  %v107_v11 = vmul.f32 6.493442, %v106_v3  ;;  %vm131_vm0 = vcmask 31744  }
  0x14   :  { %v126_v12 = vadd.f32 1e-16, %v125_v4  ;;  %v174_v2 = vadd.f32 -0.5, %v96_v7  ;;  %v118_v14 = vmul.f32 24.891752, %v117_v8 }
  0x15   :  { %v44_v0 = vadd.f32 %v159_v52, %v35_v59  ;;  %v177_v16 = vadd.f32 -0.5, %v107_v11 }
  0x16   :  { %v127_v17 = vmul.f32 5e+15, %v126_v12  ;;  %v180_v19 = vadd.f32 -0.5, %v118_v14 }
  0x17   :  { %v55_v5 = vadd.f32 %v162_v60, %v44_v0 }
  0x18   :  { %v182_v21 = vadd.f32 -0.5, %v127_v17 }
  0x19   :  { %v66_v9 = vadd.f32 %v165_v63, %v55_v5 }
  0x1b   :  { %v77_v13 = vadd.f32 %v168_v6, %v66_v9 }
  0x1d   :  { %v88_v15 = vadd.f32 %v171_v10, %v77_v13 }
  0x1f   :  { %v99_v18 = vadd.f32 %v174_v2, %v88_v15 }
  0x21   :  { %v110_v20 = vadd.f32 %v177_v16, %v99_v18 }
  0x23   :  { %v121_v22 = vadd.f32 %v180_v19, %v110_v20 }
  0x25   :  { %v130_v23 = vadd.f32 %v182_v21, %v121_v22 }
  0x27   :  { %v132_v24 = vsel %vm131_vm0, %v130_v23, 0.0 }
  0x28   :  { %133 = vadd.xlane.f32.xlu0 %v132_v24 }
  0xb5   :  { %v134_v25 = vpop.xlane.xlu0 %133 }
  0xb6   :  { %v135_v26 = vrot.slane %v134_v25, 4 }
  0xb8   :  { %v136_v27 = vadd.f32 %v135_v26, %v134_v25 }
  0xba   :  { %v137_v28 = vrot.slane %v136_v27, 2 }
  0xbc   :  { %v138_v29 = vadd.f32 %v137_v28, %v136_v27 }
  0xbe   :  { %v139_v30 = vrot.slane %v138_v29, 1 }
  0xc0   :  { %v140_v31 = vadd.f32 %v139_v30, %v138_v29 }
  0xc2   :  { %183 = vpush %v140_v31 }
  0xf3   :  { %s184_s2 = spop %183 }
  0xf4   :  { %143 = sst [smem:[#allocation2]] %s184_s2 }
  0xf5   :  { %195 = shalt.err (!%p192_p2)
}
  0xf6   :  { %s198_s5 = smov [#allocation2]  }
  0xf7   :  { %151 = dma.smem_to_hbm %s198_s5, 16, %s300_s4, [#allocation3]  }
  0xf8   :  { %196 = dma.done.wait [#allocation3], 16  }
  0xf9   :  { %197 = vsyncadd [#allocation3], 4294967280 }
  0xfa   :  { %155 = sfence }
  0xfb   :  { %156 = vsyncpa [#allocation3], 1 }

// kernel: ddgm_forward.2
= control target key start
LH: loop header
LB: loop body
LE: loop exit
PB: predicated region body
PF: predicated region fallthrough
CT: control target
= control target key end

     0   :  { %s1816_s0 = inlined_call_operand.vmem [shape: f32[9,5], index: 0, kind: input, shape index: {}]   ;;  %s1817_s1 = inlined_call_operand.vmem [shape: f32[8,10], index: 1, kind: input, shape index: {}]   ;;  %s1818_s2 = inlined_call_operand.vmem [shape: f32[9,10,32], index: 2, kind: input, shape index: {}]   ;;  %s1819_s3 = inlined_call_operand.vmem [shape: f32[9,6,32], index: 3, kind: input, shape index: {}]   ;;  %s1820_s4 = inlined_call_operand.vmem [shape: f32[9,32,32], index: 4, kind: input, shape index: {}]   ;;  %s1821_s5 = inlined_call_operand.vmem [shape: f32[9,32,10], index: 5, kind: input, shape index: {}]   ;;  %s1822_s6 = inlined_call_operand.vmem [shape: f32[9,1,10], index: 6, kind: input, shape index: {}]   ;;  %s1823_s7 = inlined_call_operand.vmem [shape: f32[9,8,4], index: 7, kind: input, shape index: {}]   ;;  %s1824_s8 = inlined_call_operand.vmem [shape: f32[9,8,6], index: 8, kind: input, shape index: {}]   ;;  %s1825_s9 = inlined_call_operand.vmem [shape: f32[9,8,4], index: 9, kind: output, shape index: {0}]   ;;  %s1826_s10 = inlined_call_operand.hbm [shape: f32[9,8,6], index: 10, kind: output, shape index: {1}]   ;;  %s1827_s11 = inlined_call_operand.hbm [shape: f32[8,10], index: 11, kind: output, shape index: {2}]  }
   0x1   :  { %1838 = sst [smem:[#allocation18_spill]] %s1816_s0 }
   0x2   :  { %1839 = sst [smem:[#allocation19_spill]] %s1817_s1 }
   0x3   :  { %1840 = sst [smem:[#allocation20_spill]] %s1818_s2 }
   0x4   :  { %1841 = sst [smem:[#allocation21_spill]] %s1819_s3 }
   0x5   :  { %1842 = sst [smem:[#allocation22_spill]] %s1826_s10 }
   0x6   :  { %1843 = sst [smem:[#allocation23_spill]] %s1827_s11 }
   0x7   :  { %17 = vsyncpa [#allocation5], 0 }
   0x8   :  { %18 = vsyncpa [#allocation4], 0 }
   0x9   :  { %20 = vsyncpa [#allocation4 + $0x1], 0 }
   0xa   :  { %21 = vsyncpa [#allocation8], 0  ;;  %s1519_s17 = smov 0   ;;  %s1521_s18 = smov 0  }
   0xb   :  { %s1523_s19 = smov 0   ;;  %s1525_s20 = smov 0  }
   0xc LB: > { %1844 = sst [smem:[#allocation12_spill]] %s1433_s17  ;;  %s1540_s21 = sadd.s32 4294967295, %s1445_s20   ;;  %s1445_s20 = sphi %s1525_s20, %s1875_s20   ;;  %s1441_s19 = sphi %s1523_s19, %s1877_s19   ;;  %s1437_s18 = sphi %s1521_s18, %s1879_s18   ;;  %s1433_s17 = sphi %s1519_s17, %s1878_s17  }
   0xd   : > { %1845 = sst [smem:[#allocation13_spill]] %s1441_s19  ;;  %s1158_s22 = sadd.s32 4294967294, %s1445_s20  }
   0xe   : > { %1846 = sst [smem:[#allocation14_spill]] %s1445_s20  ;;  %s1544_s23 = sadd.s32 1, %s1445_s20  }
   0xf   : > { %1847 = sst [smem:[#allocation15_spill]] %s1544_s23  ;;  %s284_s24 = sadd.s32 1, %s1441_s19 }
  0x10   : > { %s281_s25 = ssub.s32 %s1445_s20, %s1544_s23  ;;  %p294_p0 = scmp.ne.s32.totalorder %s1441_s19, %s1437_s18 }
  0x11   : > { %p282_p1 = scmp.eq.s32.totalorder %s281_s25, 0  ;;  %p1828_p2 = scmp.eq.s32.totalorder %s1540_s21, 8 }
  0x12   : > { %p300_p3 = scmp.ne.s32.totalorder %s1437_s18, %s1433_s17  ;;  %p301_p4 = scmp.eq.s32.totalorder %s1158_s22, 8 }
  0x13   : > { %s1555_s26 = scalar_select %p282_p1, %s1441_s19, %s284_s24  }
  0x14   : > { %p1559_p5 = por %p1828_p2, %p294_p0  ;;  %p1563_p6 = por %p301_p4, %p300_p3 }
  0x15   : > { %1848 = sst [smem:[#allocation16_spill]] %s1555_s26  ;;  %p1159_p7 = scmp.ge.s32.totalorder %s1445_s20, 1 }
  0x16   : > { %s1850_s28 = scalar_select %p1563_p6, 1, 0 }
  0x17   : > { %p329_p8 = scmp.lt.s32.totalorder %s1445_s20, 10  ;;  %p1270_p10 = scmp.eq.s32.totalorder %s1540_s21, 0 }
  0x18   : > { %1851 = sst [smem:[#allocation17_spill]] %s1850_s28  ;;  %s1853_s0 = sld [smem:[#allocation18_spill]] }
  0x19   : > { %p1571_p11 = pnand %p1159_p7, %p329_p8 }
  0x1b   : > { %p1262_p12 = pneg %p1571_p11 }
  0x1d   : > { %p1582_p13 = pnand %p1270_p10, %p1262_p12 }
  0x1e   : > { %s341_s13 = sshll.u32 %s1853_s0, 4  ;;  %s342_s13 = int_to_ptr.vmem [resolvable:$true] %s341_s13 }
  0x1f   : > { %s1334_s15 = scalar_lea.vmem %s342_s13, 256  ;;  %p1336_p1 = pneg %p1582_p13 }
  0x20   : > { %p1335_p0 = scmp.ne.s32.totalorder %s342_s13, %s1334_s15  ;;  %p1342_p7 = scmp.lt.s32.totalorder %s342_s13, %s342_s13 }
  0x21   : > { %p1343_p8 = scmp.lt.s32.totalorder %s1334_s15, %s1334_s15 }
  0x22   : > { %p1337_p3 = pnand %p1336_p1, %p1335_p0 }
  0x23   : > { %p1344_p2 = por %p1343_p8, %p1342_p7 }
  0x24   : > { %p1338_p4 = pneg %p1337_p3 }
  0x26   : > { %p1345_p9 = pnand %p1344_p2, %p1338_p4 }
  0x28   : > { %1348 = shalt.err (!%p1345_p9)
}
  0x29   : > { %s1447_s16 = smov [#allocation3]   ;;  %s1448_s22 = smov 128  }
  0x2a   : > { %s1449_s24 = smov 8   ;;  %411 = sbr.rel (%p1571_p11) target bundleno = 1866 (0x74a), region = 56 }
  0x2b   : > { %1265 = dma.vmem_to_smem (!%p1582_p13), %s342_s13, 256, %s1447_s16, [#allocation5], %s1448_s22, %s1448_s22, %s1449_s24  }
  0x31   : > { %1420 = dma.done.wait (%p1270_p10), [#allocation5], 256  }
  0x32   : > { %1422 = vsyncadd (%p1270_p10), [#allocation5], 4294967040 }
  0x33   : > { %417 = sfence }
  0x34   : > { %s1829_s25 = sand.u32 1, %s1437_s18   ;;  %p481_p2 = scmp.lt.s32.totalorder %s1540_s21, 8 }
  0x35   : > { %s1164_s30 = sshll.u32 %s1829_s25, 3  ;;  %s1855_s2 = sld [smem:[#allocation20_spill]] }
  0x36   : > { %s1601_s12 = scalar_select %p481_p2, %s1540_s21, 8 }
  0x37   : > { %s1641_s17 = scalar_lea.vmem [#allocation6], %s1164_s30  ;;  %p1857_p9 = scmp.ne.s32.totalorder %s1540_s21, 0 }
  0x38   : > { %s1191_s29 = sshll.u32 %s1601_s12, 4  ;;  %s1605_s13 = sshll.u32 %s1601_s12, 3  ;;  %vm520_vm0 = vcmask (!%p1857_p9), 80896  }
  0x39   : > { %s1192_s0 = sshll.u32 %s1601_s12, 5  ;;  %518 = sbr.rel (%p1857_p9) target bundleno = 67 (0x43), region = 64 }
  0x3a   : > { %s1622_s20 = scalar_lea.vmem %s1820_s4, %s1192_s0  ;;  %s1627_s11 = scalar_lea.vmem %s1821_s5, %s1192_s0 }
  0x3b   : > { %s485_s16 = scalar_lea.vmem %s1855_s2, %s1191_s29  ;;  %s1858_s1 = sld [smem:[#allocation19_spill]] (!%p1857_p9) }
  0x41   : > { %v519_v0 = vld [vmem:[%s1858_s1] sm:$0xff] }
  0x42   : > { %521 = vst.msk [vmem:[#allocation2] sm:$0xff] %vm520_vm0, %v519_v0 }
  0x43 PF: > { %v524_v1 = vld [vmem:[%s485_s16] sm:$0xff]  ;;  %v525_v2 = vld [vmem:[%s485_s16 + $0x8] sm:$0x3]  ;;  %vm534_vm1 = vcmask 1041408   ;;  %v1450_v3 = vmov 0.0|0.0   ;;  %vm1451_vm2 = vmmov 1   ;;  %v526_v7 = vlaneseq  ;;  %s1861_s22 = scalar_lea.vmem %s1822_s6, %s1601_s12  ;;  %s1862_s12 = scalar_lea.vmem %s1823_s7, %s1605_s13 }
  0x44   : > { %1236 = vmatprep.subr.bf16.mxu0 %v1450_v3  ;;  %v1237_v4 = vpack.c.bf16 %v525_v2, %v524_v1  ;;  %vm1238_vm3 = vmpackc.low %vm534_vm1, %vm1451_vm2  ;;  %1240 = vmatprep.subr.bf16.mxu1 %v1450_v3  ;;  %vm1452_vm4 = vmmov 0   ;;  %v1453_v5 = vmov 0.0   ;;  %vm530_vm5 = vcmask 80896   ;;  %s1859_s3 = sld [smem:[#allocation21_spill]]  ;;  %v638_v21 = vld [vmem:[%s1622_s20] sm:$0xff]  ;;  %v639_v22 = vld [vmem:[%s1622_s20 + $0x8] sm:$0xff] }
  0x45   : > { %1211 = vmatprep.mubr.msk.f32.mxu0 %vm1452_vm4, %v1453_v5  ;;  %1222 = vmatprep.mubr.msk.f32.mxu1 %vm1452_vm4, %v1453_v5  ;;  %v1658_v8 = vshrl.u32 %v526_v7, 7  ;;  %vm608_vm6 = vcmask 261120   ;;  %v640_v23 = vld [vmem:[%s1622_s20 + $0x10] sm:$0xff]  ;;  %v1241_v24 = vpack.c.bf16 %v639_v22, %v638_v21  ;;  %v641_v25 = vld [vmem:[%s1622_s20 + $0x18] sm:$0xff]  ;;  %v747_v54 = vld [vmem:[%s1627_s11] sm:$0xff]  ;;  %vm848_vm7 = vcmask 31744  }
  0x46   : > { %1239 = vmatpush3.bf16.msk.msra.mxu0 %vm1238_vm3, %v1237_v4  ;;  %v1244_v26 = vpack.c.bf16 %v641_v25, %v640_v23  ;;  %v748_v55 = vld [vmem:[%s1627_s11 + $0x8] sm:$0xff]  ;;  %v749_v56 = vld [vmem:[%s1627_s11 + $0x10] sm:$0xff]  ;;  %v750_v58 = vld [vmem:[%s1627_s11 + $0x18] sm:$0xff]  ;;  %s1696_s11 = sshll.u32 %s1540_s21, 7  ;;  %vm876_vm8 = vcmask 15360   ;;  %vm897_vm9 = vcmask 48160  }
  0x47   : > { %1246 = vmatprep.subr.bf16.mxu0 %v1450_v3  ;;  %v528_v9 = vsub.s32 0, %v1658_v8  ;;  %1242 = vmatpush3.bf16.msra.mxu1 %v1241_v24  ;;  %v625_v30 = vsub.s32 1, %v1658_v8  ;;  %v630_v31 = vsub.s32 2, %v1658_v8  ;;  %v644_v43 = vsub.s32 3, %v1658_v8  ;;  %s837_s20 = sadd.s32 3, %s1696_s11  ;;  %s839_s16 = sadd.s32 4, %s1696_s11 }
  0x48   : > { %1243 = vmatprep.subr.bf16.mxu1 %v1450_v3  ;;  %v1247_v57 = vpack.c.bf16 %v748_v55, %v747_v54  ;;  %v1250_v59 = vpack.c.bf16 %v750_v58, %v749_v56  ;;  %v734_v63 = vsub.s32 4, %v1658_v8  ;;  %v739_v0 = vsub.s32 5, %v1658_v8  ;;  %s838_s14 = sld [smem:[#allocation3 + %s837_s20]]  ;;  %s833_s29 = sadd.s32 1, %s1696_s11 }
  0x49   : > { %v1652_v6 = vld [vmem:[#allocation2] sm:$0xff]  ;;  %s840_s15 = sld [smem:[#allocation3 + %s839_s16]]  ;;  %s835_s26 = sadd.s32 2, %s1696_s11  ;;  %vm941_vm10 = vcmask 80944   ;;  %vm931_vm13 = vcmask 48144  }
  0x4a   : > { %1212 = vmatmul.mubr.msk.f32.vlgmr.msra.gmra.mrb[0].mxu0 %vm530_vm5, %v1652_v6  ;;  %s1860_s30 = scalar_lea.vmem %s1859_s3, %s1605_s13  ;;  %s834_s28 = sld [smem:[#allocation3 + %s833_s29]] }
  0x4b   : > { %1233 = vmatprep.mubr.msk.f32.mxu0 %vm1452_vm4, %v1453_v5  ;;  %v1666_v10 = vld [vmem:[%s1860_s30] sm:$0x3f]  ;;  %1245 = vmatpush3.bf16.msra.mxu1 %v1244_v26  ;;  %s836_s25 = sld [smem:[#allocation3 + %s835_s26]]  ;;  %s1864_s29 = scalar_lea.vmem %s1824_s8, %s1605_s13 }
  0x4c   : > { %v529_v11 = vrot.slane %v1666_v10, %v528_v9  ;;  %v626_v32 = vrot.slane %v1666_v10, %v625_v30  ;;  %v631_v35 = vrot.slane %v1666_v10, %v630_v31  ;;  %v645_v44 = vrot.slane %v1666_v10, %v644_v43  ;;  %1248 = vmatpush3.bf16.msra.mxu0 %v1247_v57  ;;  %s1708_s3 = sld [smem:[#allocation3 + %s1696_s11]]  ;;  %v850_v30 = vld [vmem:[%s1862_s12] sm:$0xff] }
  0x4d   : > { %1249 = vmatprep.subr.bf16.mxu0 %v1450_v3  ;;  %v735_v1 = vrot.slane %v1666_v10, %v734_v63  ;;  %v740_v7 = vrot.slane %v1666_v10, %v739_v0  ;;  %v1179_v10 = vld [vmem:[%s1861_s22] ss:$0 sm:$0xff]  ;;  %s1455_s22 = smov 124  }
  0x4e   : > { %s857_s24 = ssub.f32 1.0, %s838_s14  ;;  %v855_v8 = vstv %s838_s14  ;;  %s1863_s14 = scalar_lea.vmem %s1825_s9, %s1605_s13 }
  0x4f   : > { %s865_s19 = ssub.f32 1.0, %s840_s15  ;;  %s972_s13 = sshll.u32 %s1641_s17, 4  ;;  %s1745_s13 = int_to_ptr.vmem [resolvable:$true] %s972_s13 }
  0x50   : > { %1251 = vmatpush3.bf16.msra.mxu0 %v1250_v59  ;;  %s907_s0 = smul.f32 0.25, %s857_s24  ;;  %v843_v23 = vstv %s834_s28  ;;  %s1865_s28 = sld [smem:[#allocation22_spill]] }
  0x51   : > { %s860_s2 = smul.f32 0.5, %s857_s24  ;;  %v851_v31 = vstv %s836_s25  ;;  %s1456_s24 = smov 4  }
  0x52   : > { %s868_s30 = smul.f32 0.5, %s865_s19  ;;  %s1349_s23 = scalar_lea.vmem %s1745_s13, 128 }
  0x53   : > { %s912_s1 = smul.f32 0.25, %s865_s19  ;;  %p1350_p10 = scmp.ne.s32.totalorder %s1745_s13, %s1349_s23 }
  0x54   : > { %v869_v24 = vstv %s868_s30  ;;  %s1866_s30 = sand.u32 1, %s1437_s18  }
  0x55   : > { %v913_v25 = vstv %s912_s1  ;;  %s1454_s1 = smov 122   ;;  %s956_s10 = scalar_lea.sflag [#allocation4], %s1866_s30 }
  0x56   : > { %p1351_p11 = pnand %p1350_p10, %p1559_p5 }
  0x58   : > { %p1352_p12 = pneg %p1351_p11 }
 0x11d   : > { %v604_v12 = vpop.f32.mrb[0].mxu0 }
 0x11e   : > { %v605_v13 = vadd.f32 %v604_v12, %v529_v11  ;;  %v1213_v14 = vpop.f32.mrb[1].mxu0 }
 0x120   : > { %v609_v15 = vsel %vm608_vm6, %v605_v13, 0.0 }
 0x121   : > { %610 = vadd.xlane.f32.xlu0 %v609_v15 }
 0x1ae   : > { %v611_v16 = vpop.xlane.xlu0 %610 }
 0x1af   : > { %v613_v17 = vmul.f32 0.03125, %v611_v16  ;;  %v856_v16 = vmul.f32 %v855_v8, %v1652_v6 }
 0x1b1   : > { %v614_v18 = vsub.f32 %v605_v13, %v613_v17 }
 0x1b3   : > { %v615_v19 = vmul.f32 %v614_v18, %v614_v18 }
 0x1b5   : > { %v616_v20 = vsel %vm608_vm6, %v615_v19, 0.0  ;;  %v908_v19 = vstv %s907_s0  ;;  %s1743_s0 = scalar_lea.hbm %s1865_s28, %s1696_s11  ;;  %s1458_s11 = smov [#allocation6]  }
 0x1b6   : > { %617 = vadd.xlane.f32.xlu0 %v616_v20  ;;  %v861_v20 = vstv %s860_s2  ;;  %s1457_s2 = smov [#allocation7]   ;;  %s1353_s12 = sshll.u32 %s1458_s11, 4  ;;  %s1354_s12 = int_to_ptr.vmem [resolvable:$false] %s1353_s12 }
 0x1b7   : > { %s1750_s25 = sshll.u32 %s1457_s2, 4  ;;  %p1356_p13 = scmp.lt.s32.totalorder %s1745_s13, %s1354_s12  ;;  %s984_s25 = int_to_ptr.vmem [resolvable:$true] %s1750_s25 }
 0x243   : > { %v618_v27 = vpop.xlane.xlu0 %617 }
 0x244   : > { %v619_v28 = vmul.f32 0.03125, %v618_v27 }
 0x246   : > { %v620_v29 = vadd.f32 1e-05, %v619_v28  ;;  %v909_v28 = vadd.f32 %v908_v19, %v856_v16 }
 0x248   : > { %1318 = vrsqrt.f32 %v620_v29  ;;  %v862_v29 = vadd.f32 %v861_v20, %v856_v16 }
 0x252   : > { %v1319_v33 = vpop.eup %1318 }
 0x253   : > { %v622_v34 = vmul.f32 %v1319_v33, %v614_v18  ;;  %v863_v18 = vstv %s840_s15 }
 0x255   : > { %v627_v36 = vmul.f32 %v626_v32, %v622_v34 }
 0x257   : > { %v632_v37 = vadd.f32 %v631_v35, %v627_v36  ;;  %v846_v35 = vstv %s1708_s3 }
 0x259   : > { %v634_v38 = vmul.f32 0.70710677, %v632_v37  ;;  %v633_v40 = vmul.f32 0.5, %v632_v37 }
 0x25b   : > { %1320 = verf.f32 %v634_v38 }
 0x265   : > { %v1321_v39 = vpop.eup %1320 }
 0x266   : > { %v636_v41 = vadd.f32 1.0, %v1321_v39  ;;  %v852_v39 = vmul.f32 %v851_v31, %v850_v30 }
 0x268   : > { %v637_v42 = vmul.f32 %v636_v41, %v633_v40 }
 0x26a   : > { %1223 = vmatmul.mubr.msk.f32.vlgmr.msra.gmra.mrb[0].mxu1 %vm608_vm6, %v637_v42 }
 0x33d   : > { %v715_v45 = vpop.f32.mrb[0].mxu1 }
 0x33e   : > { %v716_v46 = vadd.f32 %v715_v45, %v645_v44  ;;  %v1224_v47 = vpop.f32.mrb[1].mxu1  ;;  %v891_v45 = vld [vmem:[%s1864_s29] sm:$0xff] }
 0x340   : > { %v719_v48 = vsel %vm608_vm6, %v716_v46, 0.0 }
 0x341   : > { %720 = vadd.xlane.f32.xlu1 %v719_v48 }
 0x3ce   : > { %v721_v49 = vpop.xlane.xlu1 %720 }
 0x3cf   : > { %v722_v50 = vmul.f32 0.03125, %v721_v49 }
 0x3d1   : > { %v723_v51 = vsub.f32 %v716_v46, %v722_v50 }
 0x3d3   : > { %v724_v52 = vmul.f32 %v723_v51, %v723_v51 }
 0x3d5   : > { %v725_v53 = vsel %vm608_vm6, %v724_v52, 0.0 }
 0x3d6   : > { %726 = vadd.xlane.f32.xlu1 %v725_v53 }
 0x463   : > { %v727_v60 = vpop.xlane.xlu1 %726 }
 0x464   : > { %v728_v61 = vmul.f32 0.03125, %v727_v60 }
 0x466   : > { %v729_v62 = vadd.f32 1e-05, %v728_v61 }
 0x468   : > { %1322 = vrsqrt.f32 %v729_v62 }
 0x472   : > { %v1323_v2 = vpop.eup %1322 }
 0x473   : > { %v731_v4 = vmul.f32 %v1323_v2, %v723_v51 }
 0x475   : > { %v736_v9 = vmul.f32 %v735_v1, %v731_v4 }
 0x477   : > { %v741_v11 = vadd.f32 %v740_v7, %v736_v9 }
 0x479   : > { %v743_v12 = vmul.f32 0.70710677, %v741_v11  ;;  %v742_v13 = vmul.f32 0.5, %v741_v11 }
 0x47b   : > { %1324 = verf.f32 %v743_v12 }
 0x485   : > { %v1325_v3 = vpop.eup %1324 }
 0x486   : > { %v745_v14 = vadd.f32 1.0, %v1325_v3 }
 0x488   : > { %v746_v15 = vmul.f32 %v745_v14, %v742_v13 }
 0x48a   : > { %1234 = vmatmul.mubr.msk.f32.vlgmr.msra.gmra.mrb[2].mxu0 %vm608_vm6, %v746_v15 }
 0x55d   : > { %v827_v17 = vpop.f32.mrb[2].mxu0 }
 0x55e   : > { %v828_v21 = vadd.f32 %v1179_v10, %v827_v17  ;;  %v1235_v22 = vpop.f32.mrb[3].mxu0 }
 0x560   : > { %v1182_v26 = vclamps-f32 %v828_v21, 5.0  ;;  %v864_v27 = vmul.f32 %v863_v18, %v828_v21 }
 0x562   : > { %v844_v32 = vmul.f32 %v1182_v26, %v843_v23  ;;  %v870_v33 = vadd.f32 %v869_v24, %v864_v27  ;;  %v914_v34 = vadd.f32 %v913_v25, %v864_v27 }
 0x564   : > { %v845_v36 = vsub.f32 %v1652_v6, %v844_v32  ;;  %v915_v37 = vmul.f32 %v914_v34, %v909_v28  ;;  %v871_v38 = vmul.f32 %v870_v33, %v862_v29 }
 0x566   : > { %917 = vrot.lane.b32.xlu1 %v915_v37, %s1454_s1  ;;  %873 = vrot.lane.b32.xlu0 %v871_v38, %s1455_s22  ;;  %v847_v40 = vmul.f32 %v846_v35, %v845_v36  ;;  %s1355_s1 = scalar_lea.vmem %s1354_s12, 256 }
 0x567   : > { %p1357_p0 = scmp.lt.s32.totalorder %s1355_s1, %s1349_s23 }
 0x568   : > { %849 = vst.msk [vmem:[%s1863_s14] sm:$0xff] %vm848_vm7, %v847_v40  ;;  %v853_v41 = vadd.f32 %v852_v39, %v847_v40 }
 0x569   : > { %p1358_p1 = por %p1357_p0, %p1356_p13 }
 0x56a   : > { %854 = vst.msk [vmem:[#allocation2] sm:$0xff] %vm848_vm7, %v853_v41 }
 0x56b   : > { %p1359_p3 = pnand %p1358_p1, %p1352_p12 }
 0x5d8   : > { %v918_v6 = vpop.permute.xlu1 %917  ;;  %v874_v42 = vpop.permute.xlu0 %873 }
 0x5d9   : > { %v920_v43 = vsel %vm848_vm7, %v918_v6, 0.0  ;;  %v877_v44 = vsel %vm876_vm8, %v874_v42, 0.0 }
 0x5da   : > { %921 = vadd.xlane.f32.xlu0 %v920_v43  ;;  %878 = vadd.xlane.f32.xlu1 %v877_v44 }
 0x5eb   : > { %937 = vrot.lane.b32.xlu1 %v891_v45, %s1456_s24 }
 0x5f0   : > { %893 = vrot.lane.b32.xlu0 %v891_v45, %s1456_s24 }
 0x667   : > { %v879_v46 = vpop.xlane.xlu1 %878  ;;  %v922_v47 = vpop.xlane.xlu0 %921 }
 0x668   : > { %v880_v48 = vadd.f32 1e-08, %v879_v46  ;;  %v923_v49 = vadd.f32 1e-08, %v922_v47 }
 0x66a   : > { %1326 = vrcp.f32 %v880_v48 }
 0x66b   : > { %1328 = vrcp.f32 %v923_v49  ;;  %v894_v57 = vpop.permute.xlu0 %893  ;;  %v938_v59 = vpop.permute.xlu1 %937 }
 0x674   : > { %v1327_v50 = vpop.eup %1326 }
 0x675   : > { %v1329_v51 = vpop.eup %1328  ;;  %v882_v52 = vmul.f32 %v1327_v50, %v871_v38 }
 0x676   : > { %v925_v53 = vmul.f32 %v1329_v51, %v915_v37 }
 0x677   : > { %v883_v54 = vmax.f32 %v882_v52, 1e-06 }
 0x678   : > { %v926_v55 = vmax.f32 %v925_v53, 1e-06 }
 0x679   : > { %1330 = vlog2.f32 %v883_v54 }
 0x67a   : > { %1332 = vlog2.f32 %v926_v55 }
 0x683   : > { %v1331_v56 = vpop.eup %1330 }
 0x684   : > { %v1333_v58 = vpop.eup %1332  ;;  %v890_v60 = vmul.f32 0.6931472, %v1331_v56 }
 0x685   : > { %v934_v61 = vmul.f32 0.6931472, %v1333_v58 }
 0x686   : > { %v896_v62 = vadd.f32 %v894_v57, %v890_v60 }
 0x687   : > { %v940_v63 = vadd.f32 %v938_v59, %v934_v61 }
 0x688   : > { %v898_v0 = vsel %vm897_vm9, %v896_v62, -inf }
 0x689   : > { %v942_v1 = vsel %vm941_vm10, %v940_v63, -inf  ;;  %899 = vmax.xlane.f32.xlu1 %v898_v0 }
 0x68a   : > { %943 = vmax.xlane.f32.xlu0 %v942_v1 }
 0x69a   : > { %928 = vrot.lane.b32.xlu1 %v926_v55, %s1455_s22 }
 0x6a0   : > { %885 = vrot.lane.b32.xlu0 %v883_v54, %s1455_s22 }
 0x716   : > { %v900_v2 = vpop.xlane.xlu1 %899 }
 0x717   : > { %vm901_vm11 = vcmp.ge.f32.partialorder %v896_v62, %v900_v2  ;;  %v944_v4 = vpop.xlane.xlu0 %943 }
 0x718   : > { %v1183_v7 = vsel %vm901_vm11, 1.0, %v1453_v5  ;;  %vm945_vm12 = vcmp.ge.f32.partialorder %v940_v63, %v944_v4 }
 0x719   : > { %904 = vst.msk [vmem:[#allocation2] sm:$0xff] %vm897_vm9, %v1183_v7  ;;  %v1184_v9 = vsel %vm945_vm12, 1.0, %v1453_v5 }
 0x71a   : > { %948 = vst.msk [vmem:[#allocation2] sm:$0xff] %vm941_vm10, %v1184_v9  ;;  %v929_v11 = vpop.permute.xlu1 %928 }
 0x71b   : > { %v886_v12 = vpop.permute.xlu0 %885 }
 0x71c   : > { %888 = vst.msk [vmem:[%s1641_s17] sm:$0xff] %vm876_vm8, %v886_v12 }
 0x71d   : > { %932 = vst.msk [vmem:[%s1641_s17] sm:$0xff] %vm931_vm13, %v929_v11 }
 0x71e   : > { %1362 = shalt.err (!%p1359_p3)
}
 0x71f   : > { %s1363_s17 = scalar_lea.hbm %s1743_s0, 128  ;;  %s1367_s16 = scalar_lea.hbm %s1865_s28, 1152 }
 0x720   : > { %p1364_p4 = scmp.ne.s32.totalorder %s1743_s0, %s1363_s17  ;;  %p1368_p2 = scmp.lt.u32.totalorder %s1743_s0, %s1865_s28 }
 0x721   : > { %p1369_p9 = scmp.lt.u32.totalorder %s1367_s16, %s1363_s17  ;;  %p1371_p11 = scmp.lt.u32.totalorder %s1363_s17, %s1743_s0 }
 0x722   : > { %p1365_p7 = pnand %p1364_p4, %p1559_p5 }
 0x723   : > { %p1370_p10 = por %p1369_p9, %p1368_p2 }
 0x724   : > { %p1366_p8 = pneg %p1365_p7 }
 0x725   : > { %p1372_p12 = por %p1371_p11, %p1370_p10 }
 0x727   : > { %p1373_p13 = pnand %p1372_p12, %p1366_p8 }
 0x729   : > { %1376 = shalt.err (!%p1373_p13)
}
 0x72a   : > { %1256 = dma.vmem_to_hbm [thread:$0]  (%p1559_p5), %s1745_s13, 128, %s1743_s0, %s956_s10   ;;  %v949_v5 = vld [vmem:[#allocation2] sm:$0xff] }
 0x72b   : > { %950 = vst.msk [vmem:[#allocation7] sm:$0xff] %vm530_vm5, %v949_v5  ;;  %s1377_s15 = scalar_lea.vmem %s984_s25, 128  ;;  %p1867_p1 = scmp.eq.s32.totalorder %s1540_s21, 8 }
 0x72c   : > { %p1378_p0 = scmp.ne.s32.totalorder %s984_s25, %s1377_s15  ;;  %p1384_p7 = scmp.lt.s32.totalorder %s984_s25, %s984_s25 }
 0x72d   : > { %p1385_p2 = scmp.lt.s32.totalorder %s1377_s15, %s1377_s15 }
 0x72e   : > { %p1379_p3 = pnand %p1378_p0, %p1867_p1 }
 0x72f   : > { %p1386_p8 = por %p1385_p2, %p1384_p7 }
 0x730   : > { %p1380_p4 = pneg %p1379_p3 }
 0x732   : > { %p1387_p9 = pnand %p1386_p8, %p1380_p4 }
 0x734   : > { %1390 = shalt.err (!%p1387_p9)
}
 0x735   : > { %s1868_s24 = sld [smem:[#allocation23_spill]]  ;;  %p1869_p10 = pmov %p1867_p1 }
 0x73b   : > { %s1391_s19 = scalar_lea.hbm %s1868_s24, 128 }
 0x73c   : > { %p1392_p5 = scmp.ne.s32.totalorder %s1868_s24, %s1391_s19  ;;  %p1397_p13 = scmp.lt.u32.totalorder %s1391_s19, %s1868_s24 }
 0x73e   : > { %p1393_p11 = pnand %p1392_p5, %p1869_p10 }
 0x740   : > { %p1394_p12 = pneg %p1393_p11 }
 0x742   : > { %p1399_p0 = pnand %p1397_p13, %p1394_p12 }
 0x744   : > { %1402 = shalt.err (!%p1399_p0)
}
 0x745   : > { %1258 = dma.vmem_to_hbm [thread:$0]  (%p1867_p1), %s984_s25, 128, %s1868_s24, [#allocation8]  }
 0x746   : > { %p1870_p3 = pmov %p1867_p1 }
 0x747   : > { %p1871_p4 = pmov %p1867_p1 }
 0x748   : > { %1424 = dma.done.wait (%p1870_p3), [#allocation8], 128  }
 0x749   : > { %1426 = vsyncadd (%p1871_p4), [#allocation8], 4294967168 }
 0x74a PF: > { %s1872_s23 = sld [smem:[#allocation14_spill]]  ;;  %s1873_s11 = sld [smem:[#allocation12_spill]] }
 0x750   : > { %p1274_p7 = scmp.ge.s32.totalorder %s1872_s23, 2  ;;  %s1006_s1 = sand.u32 1, %s1873_s11  }
 0x751   : > { %s1007_s17 = scalar_lea.sflag [#allocation4], %s1006_s1 }
 0x752   : > { %p1267_p2 = pnand %p1274_p7, %p1563_p6 }
 0x754   : > { %1428 = dma.done.wait (!%p1267_p2), %s1007_s17, 128  }
 0x755   : > { %1430 = vsyncadd (!%p1267_p2), %s1007_s17, 4294967168  ;;  %s1875_s20 = sld [smem:[#allocation15_spill]]  ;;  %s1876_s22 = sld [smem:[#allocation13_spill]] }
 0x756   : > { %s1877_s19 = sld [smem:[#allocation16_spill]]  ;;  %s1878_s17 = smov %s1437_s18 }
 0x75b   : > { %p24_p8 = scmp.ge.s32.totalorder %s1875_s20, 11   ;;  %s1879_s18 = smov %s1876_s22 }
 0x75d   :  { %26 = sbr.rel (!%p24_p8) target bundleno = 12 (0xc), region = 138 }
 0x764   :  { %1012 = vsyncpa [#allocation4], 1 }
 0x765   :  { %1014 = vsyncpa [#allocation4 + $0x1], 1 }
 0x766   :  { %1015 = vsyncpa [#allocation8], 1 }
 0x767   :  { %1016 = vsyncpa [#allocation5], 1 }
 0x768   :  { %1018 = vsyncpa [#allocation5 + $0x1], 1 }

</bundles_post_ra>
